<compile_context>
chip_gen: v7x
topology: tpu7x:2x2x1
jax: 0.10.0
libtpu: 0.0.40
codegen_flags: <defaults>
</compile_context>

<pallas_src>
import functools

import jax
import jax.numpy as jnp
from jax.experimental import pallas as pl
from jax.experimental.pallas import tpu as pltpu


def _tpu_generation() -> int:
    """Best-effort TPU generation from device_kind; 0 if unknown."""
    try:
        kind = jax.devices()[0].device_kind.lower()
    except Exception:
        return 0
    for gen in (7, 6, 5, 4, 3, 2):
        if f"v{gen}" in kind:
            return gen
    return 0


def _neuron_kernel(x_ref, w_ref, b_ref, o_ref, *, epilogue_dtype):
    # x_ref : (TM, E)   f32  VMEM  (input rows; tile follows grid axis i)
    # w_ref : (E,  TN)  bf16 VMEM  (pre-transposed weights; tile follows j)
    # b_ref : (1,  TN)  f32  VMEM  (bias row; follows j -- 4 KiB/step re-DMA,
    #                               negligible vs the output-tile writeback)
    # o_ref : (TM, TN)       VMEM
    x = x_ref[...].astype(jnp.bfloat16)          # in-kernel cast: no extra HBM pass
    # (TM, E) @ (E, TN) -> (TM, TN); lane-dense (K, N) RHS feeds the MXU
    # without a per-step relayout; accumulate in f32.
    acc = jnp.dot(x, w_ref[...], preferred_element_type=jnp.float32)
    out = acc + b_ref[...]                       # bias broadcast over rows (f32)
    # Transcendental-heavy part of the epilogue in bf16 on v6e/v7x (bf16
    # VPU/EUP), f32 on v5e / unknown chips.
    out = out.astype(epilogue_dtype)
    # TODO(synk): `activationFunction` is an external config symbol in the
    # source module; tanh-approx GELU is used here (switch to
    # jax.nn.gelu(..., approximate=False) for exact PyTorch nn.GELU parity).
    out = jax.nn.gelu(out)
    out = jnp.clip(out, -5.0, 5.0)               # output.clamp_(-5, 5)
    o_ref[...] = out.astype(o_ref.dtype)


def neuron_forward(input_embeds, weights, biases, *, tm=2048, tn=1024,
                   out_dtype=None):
    """input_embeds: (B, S, E), weights: (N, E), biases: (N,) -> (B, S, N)."""
    B, S, E = input_embeds.shape
    N, E_w = weights.shape
    assert E == E_w, (E, E_w)
    M = B * S

    gen = _tpu_generation()
    # bf16 epilogue only where the VPU/EUP are bf16-capable (v6e / v7x).
    epilogue_dtype = jnp.bfloat16 if gen >= 6 else jnp.float32
    if gen >= 7:
        vmem_limit = 48 * 1024 * 1024    # 64 MiB physical/TC -> leave headroom
    elif gen >= 4:
        vmem_limit = 64 * 1024 * 1024    # 128 MiB physical
    else:
        vmem_limit = 32 * 1024 * 1024

    # Tile sizes: clamp to the full extent for small problems.  When clamped,
    # the block equals the full array dim (always legal); otherwise tm is a
    # multiple of 8 and tn a multiple of 128, so the (8,128) rule holds and
    # output stores stay lane-dense.
    tm = min(tm, M)
    tn = min(tn, N)
    # Megacore (v7x: 2 TCs shard the "parallel" axes): guarantee >= 2 grid
    # steps so no core idles.  Harmless (~0.35 us extra) on 1-TC chips.
    if pl.cdiv(M, tm) * pl.cdiv(N, tn) == 1 and M > 8:
        tm = max(8, -(-(M // 2) // 8) * 8)       # ~M/2, rounded up to mult of 8

    x2d = input_embeds.reshape(M, E)
    # One-time pass over a tiny (N, E) array; if the same weights are reused
    # across many forward calls, hoist/cache this conversion at the call site.
    w_t = weights.astype(jnp.bfloat16).T               # (E, N), lane-dense RHS
    b2d = biases.reshape(1, N).astype(jnp.float32)

    # Default keeps f32 output for semantic parity with the PyTorch module;
    # pass out_dtype=jnp.bfloat16 to halve the dominant HBM write on v5e/v6e
    # if the caller tolerates it.
    out_dtype = input_embeds.dtype if out_dtype is None else out_dtype

    grid = (pl.cdiv(M, tm), pl.cdiv(N, tn))

    cost = pl.CostEstimate(
        flops=2 * M * E * N,
        transcendentals=M * N,                          # one tanh per output elem
        bytes_accessed=(4 * M * E + 2 * N * E + 4 * N
                        + jnp.dtype(out_dtype).itemsize * M * N),
    )

    kernel = functools.partial(_neuron_kernel, epilogue_dtype=epilogue_dtype)

    out2d = pl.pallas_call(
        kernel,
        out_shape=jax.ShapeDtypeStruct((M, N), out_dtype),
        grid_spec=pl.GridSpec(
            grid=grid,
            in_specs=[
                pl.BlockSpec((tm, E), lambda i, j: (i, 0)),   # x rows follow i
                pl.BlockSpec((E, tn), lambda i, j: (0, j)),   # W cols follow j
                pl.BlockSpec((1, tn), lambda i, j: (0, j)),   # bias follows j
            ],
            out_specs=pl.BlockSpec((tm, tn), lambda i, j: (i, j)),
        ),
        compiler_params=pltpu.CompilerParams(
            dimension_semantics=("parallel", "parallel"),
            vmem_limit_bytes=vmem_limit,
        ),
        cost_estimate=cost,
    )(x2d, w_t, b2d)

    return out2d.reshape(B, S, N)


if __name__ == "__main__":
    # Small shapes consistent with the module; seq large enough that the
    # default path still splits M across two grid tiles (megacore check).
    batch, seq = 2, 512
    embed_dimension = 32      # embedDimension
    num_neurons = 256         # numNeurons (lane-dense output)

    key = jax.random.PRNGKey(0)
    k_x, k_w, k_b = jax.random.split(key, 3)

    # nn.Parameter shapes: n_weights = randn(numNeurons, embedDimension)*0.01,
    # n_biases = zeros(numNeurons).  Nonzero biases used here purely to
    # exercise the bias-broadcast path in the test.
    weights = jax.random.normal(k_w, (num_neurons, embed_dimension), jnp.float32) * 0.01
    biases = jax.random.normal(k_b, (num_neurons,), jnp.float32) * 0.01
    input_embeds = jax.random.normal(k_x, (batch, seq, embed_dimension), jnp.float32)

    # Pure-JAX f32 reference of the same semantics (kernel uses bf16 matmul
    # operands / possibly bf16 epilogue, hence the loosened tolerance).
    ref = jnp.clip(
        jax.nn.gelu(jnp.matmul(input_embeds, weights.T) + biases), -5.0, 5.0
    )

    # Default (large-tile) path.
    out = neuron_forward(input_embeds, weights, biases)
    jax.block_until_ready(out)
    assert out.shape == (batch, seq, num_neurons)
    assert out.dtype == input_embeds.dtype
    assert jnp.allclose(out, ref, atol=5e-3, rtol=5e-2), (
        float(jnp.max(jnp.abs(out - ref)))
    )

    # Explicit small tiles: exercises a multi-tile (4, 2) grid on any chip.
    out_tiled = neuron_forward(input_embeds, weights, biases, tm=256, tn=128)
    jax.block_until_ready(out_tiled)
    assert jnp.allclose(out_tiled, ref, atol=5e-3, rtol=5e-2), (
        float(jnp.max(jnp.abs(out_tiled - ref)))
    )

    print("KERNEL_OK")
</pallas_src>

<mosaic_0001>
module attributes {stable_mosaic.version = 11 : i64} {
  func.func @_neuron_kernel(%arg0: i32, %arg1: i32, %arg2: memref<512x32xf32, #tpu.memory_space<vmem>>, %arg3: memref<32x256xbf16, #tpu.memory_space<vmem>>, %arg4: memref<1x256xf32, #tpu.memory_space<vmem>>, %arg5: memref<512x256xf32, #tpu.memory_space<vmem>>) attributes {dimension_semantics = [#tpu.dimension_semantics<parallel>, #tpu.dimension_semantics<parallel>], iteration_bounds = array<i64: 2, 1>, scalar_prefetch = 0 : i64, scratch_operands = 0 : i64, tpu.core_type = #tpu.core_type<tc>, window_params = [{transform_indices = @transform_0, window_bounds = array<i64: 512, 32>}, {transform_indices = @transform_1, window_bounds = array<i64: 32, 256>}, {transform_indices = @transform_2, window_bounds = array<i64: 1, 256>}, {transform_indices = @transform_3, window_bounds = array<i64: 512, 256>}]} {
    %c0 = arith.constant 0 : index
    %c0_0 = arith.constant 0 : index
    %0 = vector.load %arg2[%c0, %c0_0] : memref<512x32xf32, #tpu.memory_space<vmem>>, vector<512x32xf32>
    %1 = arith.truncf %0 : vector<512x32xf32> to vector<512x32xbf16>
    %c0_1 = arith.constant 0 : index
    %c0_2 = arith.constant 0 : index
    %2 = vector.load %arg3[%c0_1, %c0_2] : memref<32x256xbf16, #tpu.memory_space<vmem>>, vector<32x256xbf16>
    %cst = arith.constant dense<0.000000e+00> : vector<512x256xf32>
    %3 = tpu.matmul %1, %2, %cst {dimension_numbers = #tpu.dot_dimension_numbers<[1], [0], [0], [1], [0, 0, 1, 1], [], []>} : vector<512x32xbf16>, vector<32x256xbf16>, vector<512x256xf32> -> vector<512x256xf32>
    %c0_3 = arith.constant 0 : index
    %c0_4 = arith.constant 0 : index
    %4 = vector.load %arg4[%c0_3, %c0_4] : memref<1x256xf32, #tpu.memory_space<vmem>>, vector<1x256xf32>
    %5 = vector.broadcast %4 : vector<1x256xf32> to vector<512x256xf32>
    %6 = arith.addf %3, %5 : vector<512x256xf32>
    %7 = arith.mulf %6, %6 : vector<512x256xf32>
    %8 = arith.mulf %6, %7 : vector<512x256xf32>
    %cst_5 = arith.constant 4.471500e-02 : f32
    %9 = vector.broadcast %cst_5 : f32 to vector<512x256xf32>
    %10 = arith.mulf %9, %8 : vector<512x256xf32>
    %11 = arith.addf %6, %10 : vector<512x256xf32>
    %cst_6 = arith.constant 0.797884583 : f32
    %12 = vector.broadcast %cst_6 : f32 to vector<512x256xf32>
    %13 = arith.mulf %12, %11 : vector<512x256xf32>
    %14 = math.tanh %13 : vector<512x256xf32>
    %cst_7 = arith.constant 1.000000e+00 : f32
    %15 = vector.broadcast %cst_7 : f32 to vector<512x256xf32>
    %16 = arith.addf %15, %14 : vector<512x256xf32>
    %cst_8 = arith.constant 5.000000e-01 : f32
    %17 = vector.broadcast %cst_8 : f32 to vector<512x256xf32>
    %18 = arith.mulf %17, %16 : vector<512x256xf32>
    %19 = arith.mulf %6, %18 : vector<512x256xf32>
    %cst_9 = arith.constant -5.000000e+00 : f32
    %cst_10 = arith.constant 5.000000e+00 : f32
    %20 = vector.broadcast %cst_9 : f32 to vector<512x256xf32>
    %21 = arith.maximumf %20, %19 : vector<512x256xf32>
    %22 = vector.broadcast %cst_10 : f32 to vector<512x256xf32>
    %23 = arith.minimumf %22, %21 : vector<512x256xf32>
    %c0_11 = arith.constant 0 : index
    %c0_12 = arith.constant 0 : index
    %24 = vector.load %arg5[%c0_11, %c0_12] : memref<512x256xf32, #tpu.memory_space<vmem>>, vector<512x256xf32>
    tpu.vector_store %arg5[%c0_11, %c0_12], %23 {strides = array<i32>} : memref<512x256xf32, #tpu.memory_space<vmem>>, vector<512x256xf32>,
    return
  }
  func.func @transform_0(%arg0: i32, %arg1: i32) -> (i32, i32) {
    %c0_i32 = arith.constant 0 : i32
    %c0_i32_0 = arith.constant 0 : i32
    return %arg0, %c0_i32 : i32, i32
  }
  func.func @transform_1(%arg0: i32, %arg1: i32) -> (i32, i32) {
    %c0_i32 = arith.constant 0 : i32
    %c0_i32_0 = arith.constant 0 : i32
    return %c0_i32, %arg1 : i32, i32
  }
  func.func @transform_2(%arg0: i32, %arg1: i32) -> (i32, i32) {
    %c0_i32 = arith.constant 0 : i32
    %c0_i32_0 = arith.constant 0 : i32
    return %c0_i32, %arg1 : i32, i32
  }
  func.func @transform_3(%arg0: i32, %arg1: i32) -> (i32, i32) {
    %c0_i32 = arith.constant 0 : i32
    return %arg0, %arg1 : i32, i32
  }
}

</mosaic_0001>

<bundles_post_ra>
// kernel: tpu_custom_call.1
= control target key start
LH: loop header
LB: loop body
LE: loop exit
PB: predicated region body
PF: predicated region fallthrough
CT: control target
= control target key end

     0   :  { %8 = vsyncpa [#allocation3], 0  ;;  %s4838_s0 = inlined_call_operand.vmem [shape: f32[1024,32], index: 0, kind: input, shape index: {}]   ;;  %s4839_s1 = inlined_call_operand.vmem [shape: bf16[32,256], index: 1, kind: input, shape index: {}]   ;;  %s4840_s2 = inlined_call_operand.vmem [shape: f32[1,256], index: 2, kind: input, shape index: {}]   ;;  %s4841_s3 = inlined_call_operand.hbm [shape: f32[1024,256], index: 3, kind: output, shape index: {}]  }
   0x1   :  { %10 = vsyncpa [#allocation3 + $0x1], 0  ;;  %s3074_s12 = smov 0   ;;  %s3076_s13 = smov 0  }
   0x2   :  { %s3078_s14 = smov 0   ;;  %s3080_s15 = smov 0  }
   0x3   :  { %s3082_s16 = smov 0   ;;  %s3084_s17 = smov 0  }
   0x4 LB: > { %s2464_s18 = sadd.s32 4294967295, %s3048_s17   ;;  %s2465_s19 = sadd.s32 4294967294, %s3048_s17   ;;  %s3048_s17 = sphi %s3084_s17, %s16_s17   ;;  %s3044_s16 = sphi %s3082_s16, %s4928_s16   ;;  %s3040_s15 = sphi %s3080_s15, %s4927_s15   ;;  %s3036_s14 = sphi %s3078_s14, %s4926_s14   ;;  %s3032_s13 = sphi %s3076_s13, %s4925_s13   ;;  %s3028_s12 = sphi %s3074_s12, %s4924_s12  }
   0x5   : > { %s28_s20 = sadd.s32 1, %s3044_s16  ;;  %s115_s21 = sadd.s32 1, %s3036_s14 }
   0x6   : > { %p30_p0 = scmp.ge.s32.totalorder %s28_s20, 2  ;;  %p125_p1 = scmp.ne.s32.totalorder %s3036_s14, %s3032_s13 }
   0x7   : > { %p126_p2 = scmp.eq.s32.totalorder %s2464_s18, 1  ;;  %p131_p3 = scmp.ne.s32.totalorder %s3032_s13, %s3028_s12 }
   0x8   : > { %s4930_s20 = smov (%p30_p0, %s28_s20), 0  ;;  %p132_p5 = scmp.eq.s32.totalorder %s2465_s19, 1 }
   0x9   : > { %p3114_p4 = por %p126_p2, %p125_p1  ;;  %s110_s23 = ssub.s32 %s3044_s16, %s4930_s20 }
   0xa   : > { %p2470_p6 = scmp.ge.s32.totalorder %s3048_s17, 1  ;;  %p113_p7 = scmp.eq.s32.totalorder %s110_s23, 0 }
   0xb   : > { %p3121_p8 = por %p132_p5, %p131_p3  ;;  %p176_p9 = scmp.lt.s32.totalorder %s3048_s17, 3 }
   0xc   : > { %s3127_s25 = scalar_select %p113_p7, %s3036_s14, %s115_s21  }
   0xd   : > { %p177_p10 = pnand %p2470_p6, %p176_p9 }
   0xf   : > { %180 = sbr.rel (%p177_p10) target bundleno = 630 (0x276), region = 32 }
  0x16   : > { %v2708_v0 = vld [vmem:[%s4839_s1 + $0x4] ss:$8 sps:$4 sm:$0xff]   ;;  %s2472_s28 = sshll.u32 %s3040_s15, 6  ;;  %v2710_v1 = vld [vmem:[%s4839_s1] ss:$8 sps:$4 sm:$0xff]   ;;  %v3050_v2 = vmov 0  }
  0x17   : > { %490 = vmatprep.mubr.bf16.mxu0 %v3050_v2  ;;  %650 = vmatprep.mubr.bf16.mxu1 %v3050_v2  ;;  %p210_p11 = scmp.lt.s32.totalorder %s2472_s28, 127  ;;  %v2711_v3 = vld [vmem:[%s4839_s1 + $0x14] ss:$8 sps:$4 sm:$0xff]   ;;  %v2713_v4 = vld [vmem:[%s4839_s1 + $0x10] ss:$8 sps:$4 sm:$0xff]   ;;  %vm361_vm0 = vcmask 261120  }
  0x18   : > { %458 = vmatprep.subr.bf16.mxu0 %v2708_v0  ;;  %2646 = vmatprep.subr.bf16.mxu1 %v2708_v0  ;;  %s206_s21 = sand.u32 1, %s3032_s13   ;;  %s2645_s27 = sshll.u32 %s3040_s15, 14 }
  0x19   : > { %459 = vmatpush1.bf16.msra.mxu0 %v2710_v1  ;;  %2648 = vmatpush1.bf16.msra.mxu1 %v2710_v1  ;;  %s4932_s28 = smov (!%p210_p11, %s2472_s28), 127  ;;  %s3406_s23 = sshll.u32 %s206_s21, 10 }
  0x1a   : > { %460 = vmatprep.subr.bf16.mxu0 %v2711_v3  ;;  %2647 = vmatprep.subr.bf16.mxu1 %v2711_v3  ;;  %s2473_s8 = sshll.u32 %s4932_s28, 3  ;;  %s3432_s26 = scalar_lea.vmem [#allocation2], %s3406_s23 }
  0x1b   : > { %s3147_s11 = scalar_lea.vmem %s4838_s0, %s2473_s8  ;;  %s2364_s28 = sshll.u32 %s3432_s26, 4  ;;  %s4786_s28 = int_to_ptr.vmem [resolvable:$true] %s2364_s28 }
  0x1c   : > { %v229_v5 = vld [vmem:[%s3147_s11] sm:$0xff]  ;;  %v230_v6 = vld [vmem:[%s3147_s11 + $0x8] sm:$0xff]  ;;  %v231_v11 = vld [vmem:[%s3147_s11 + $0x10] sm:$0xff]  ;;  %s4784_s4 = scalar_lea.hbm %s4841_s3, %s2645_s27  ;;  %s4792_s5 = scalar_lea.sflag [#allocation3], %s206_s21 }
  0x1d   : > { %461 = vmatpush1.bf16.msra.mxu0 %v2713_v4  ;;  %2649 = vmatpush1.bf16.msra.mxu1 %v2713_v4  ;;  %v261_v7 = vld [vmem:[%s3147_s11 + $0x100] sm:$0xff]  ;;  %v293_v8 = vpack.c.bf16 %v230_v6, %v229_v5  ;;  %v262_v9 = vld [vmem:[%s3147_s11 + $0x108] sm:$0xff]  ;;  %v232_v12 = vld [vmem:[%s3147_s11 + $0x18] sm:$0xff]  ;;  %s2970_s15 = scalar_lea.vmem %s4786_s28, 16384  ;;  %s3051_s6 = smov [#allocation2]  }
  0x1e   : > { %v309_v10 = vpack.c.bf16 %v262_v9, %v261_v7  ;;  %v263_v13 = vld [vmem:[%s3147_s11 + $0x110] sm:$0xff]  ;;  %v264_v14 = vld [vmem:[%s3147_s11 + $0x118] sm:$0xff]  ;;  %v294_v15 = vpack.c.bf16 %v232_v12, %v231_v11  ;;  %v233_v17 = vld [vmem:[%s3147_s11 + $0x20] sm:$0xff]  ;;  %p2971_p12 = scmp.ne.s32.totalorder %s4786_s28, %s2970_s15  ;;  %s2974_s7 = sshll.u32 %s3051_s6, 4  ;;  %s2975_s7 = int_to_ptr.vmem [resolvable:$false] %s2974_s7 }
  0x1f   : > { %v310_v16 = vpack.c.bf16 %v264_v14, %v263_v13  ;;  %v234_v18 = vld [vmem:[%s3147_s11 + $0x28] sm:$0xff]  ;;  %v265_v19 = vld [vmem:[%s3147_s11 + $0x120] sm:$0xff]  ;;  %v235_v23 = vld [vmem:[%s3147_s11 + $0x30] sm:$0xff]  ;;  %s2976_s8 = scalar_lea.vmem %s2975_s7, 32768  ;;  %p2977_p1 = scmp.lt.s32.totalorder %s4786_s28, %s2975_s7 }
  0x20   : > { %2478 = vmatmul.mubr.msk.bf16.vlgmr.msra.gmra.mrb[0].mxu0 %vm361_vm0, %v293_v8  ;;  %2494 = vmatmul.mubr.msk.bf16.vlgmr.msra.gmra.mrb[0].mxu1 %vm361_vm0, %v309_v10  ;;  %v266_v20 = vld [vmem:[%s3147_s11 + $0x128] sm:$0xff]  ;;  %v295_v21 = vpack.c.bf16 %v234_v18, %v233_v17  ;;  %v236_v24 = vld [vmem:[%s3147_s11 + $0x38] sm:$0xff]  ;;  %v267_v25 = vld [vmem:[%s3147_s11 + $0x130] sm:$0xff]  ;;  %p2972_p13 = pnand %p2971_p12, %p3114_p4  ;;  %p2978_p2 = scmp.lt.s32.totalorder %s2976_s8, %s2970_s15 }
  0x21   : > { %500 = vmatprep.mubr.bf16.mxu0 %v3050_v2  ;;  %660 = vmatprep.mubr.bf16.mxu1 %v3050_v2  ;;  %v311_v22 = vpack.c.bf16 %v266_v20, %v265_v19  ;;  %v268_v26 = vld [vmem:[%s3147_s11 + $0x138] sm:$0xff]  ;;  %v296_v27 = vpack.c.bf16 %v236_v24, %v235_v23  ;;  %v237_v29 = vld [vmem:[%s3147_s11 + $0x40] sm:$0xff]  ;;  %v238_v30 = vld [vmem:[%s3147_s11 + $0x48] sm:$0xff] }
  0x22   : > { %v312_v28 = vpack.c.bf16 %v268_v26, %v267_v25  ;;  %v269_v31 = vld [vmem:[%s3147_s11 + $0x140] sm:$0xff]  ;;  %v270_v32 = vld [vmem:[%s3147_s11 + $0x148] sm:$0xff]  ;;  %v297_v33 = vpack.c.bf16 %v238_v30, %v237_v29  ;;  %v239_v35 = vld [vmem:[%s3147_s11 + $0x50] sm:$0xff]  ;;  %p2973_p0 = pneg %p2972_p13  ;;  %p2979_p3 = por %p2978_p2, %p2977_p1 }
  0x23   : > { %v313_v34 = vpack.c.bf16 %v270_v32, %v269_v31  ;;  %v240_v36 = vld [vmem:[%s3147_s11 + $0x58] sm:$0xff]  ;;  %v271_v37 = vld [vmem:[%s3147_s11 + $0x150] sm:$0xff]  ;;  %v241_v41 = vld [vmem:[%s3147_s11 + $0x60] sm:$0xff] }
  0x24   : > { %v272_v38 = vld [vmem:[%s3147_s11 + $0x158] sm:$0xff]  ;;  %v298_v39 = vpack.c.bf16 %v240_v36, %v239_v35  ;;  %v242_v42 = vld [vmem:[%s3147_s11 + $0x68] sm:$0xff]  ;;  %v273_v43 = vld [vmem:[%s3147_s11 + $0x160] sm:$0xff]  ;;  %p2980_p5 = pnand %p2979_p3, %p2973_p0 }
  0x25   : > { %v314_v40 = vpack.c.bf16 %v272_v38, %v271_v37  ;;  %v274_v44 = vld [vmem:[%s3147_s11 + $0x168] sm:$0xff]  ;;  %v299_v45 = vpack.c.bf16 %v242_v42, %v241_v41  ;;  %v243_v47 = vld [vmem:[%s3147_s11 + $0x70] sm:$0xff]  ;;  %v244_v48 = vld [vmem:[%s3147_s11 + $0x78] sm:$0xff]  ;;  %v331_v38 = vlaneseq }
  0x26   : > { %v315_v46 = vpack.c.bf16 %v274_v44, %v273_v43  ;;  %v275_v49 = vld [vmem:[%s3147_s11 + $0x170] sm:$0xff]  ;;  %v276_v50 = vld [vmem:[%s3147_s11 + $0x178] sm:$0xff]  ;;  %v300_v51 = vpack.c.bf16 %v244_v48, %v243_v47  ;;  %v245_v53 = vld [vmem:[%s3147_s11 + $0x80] sm:$0xff] }
  0x27   : > { %v316_v52 = vpack.c.bf16 %v276_v50, %v275_v49  ;;  %v246_v54 = vld [vmem:[%s3147_s11 + $0x88] sm:$0xff]  ;;  %v277_v55 = vld [vmem:[%s3147_s11 + $0x180] sm:$0xff]  ;;  %v247_v59 = vld [vmem:[%s3147_s11 + $0x90] sm:$0xff] }
  0x28   : > { %2479 = vmatmul.mubr.msk.bf16.gmra.mrb[4].mxu0 %vm361_vm0, %v294_v15  ;;  %2495 = vmatmul.mubr.msk.bf16.gmra.mrb[4].mxu1 %vm361_vm0, %v310_v16  ;;  %v278_v56 = vld [vmem:[%s3147_s11 + $0x188] sm:$0xff]  ;;  %v301_v57 = vpack.c.bf16 %v246_v54, %v245_v53  ;;  %v248_v60 = vld [vmem:[%s3147_s11 + $0x98] sm:$0xff]  ;;  %v279_v61 = vld [vmem:[%s3147_s11 + $0x190] sm:$0xff] }
  0x29   : > { %510 = vmatprep.mubr.bf16.mxu0 %v3050_v2  ;;  %670 = vmatprep.mubr.bf16.mxu1 %v3050_v2  ;;  %v317_v58 = vpack.c.bf16 %v278_v56, %v277_v55  ;;  %v280_v62 = vld [vmem:[%s3147_s11 + $0x198] sm:$0xff]  ;;  %v302_v63 = vpack.c.bf16 %v248_v60, %v247_v59  ;;  %v249_v1 = vld [vmem:[%s3147_s11 + $0xa0] sm:$0xff]  ;;  %v250_v3 = vld [vmem:[%s3147_s11 + $0xa8] sm:$0xff] }
  0x2a   : > { %v318_v0 = vpack.c.bf16 %v280_v62, %v279_v61  ;;  %v281_v4 = vld [vmem:[%s3147_s11 + $0x1a0] sm:$0xff]  ;;  %v282_v5 = vld [vmem:[%s3147_s11 + $0x1a8] sm:$0xff]  ;;  %v303_v6 = vpack.c.bf16 %v250_v3, %v249_v1  ;;  %v251_v8 = vld [vmem:[%s3147_s11 + $0xb0] sm:$0xff] }
  0x2b   : > { %v319_v7 = vpack.c.bf16 %v282_v5, %v281_v4  ;;  %v252_v9 = vld [vmem:[%s3147_s11 + $0xb8] sm:$0xff]  ;;  %v283_v10 = vld [vmem:[%s3147_s11 + $0x1b0] sm:$0xff]  ;;  %v253_v14 = vld [vmem:[%s3147_s11 + $0xc0] sm:$0xff] }
  0x2c   : > { %v284_v11 = vld [vmem:[%s3147_s11 + $0x1b8] sm:$0xff]  ;;  %v304_v12 = vpack.c.bf16 %v252_v9, %v251_v8  ;;  %v254_v15 = vld [vmem:[%s3147_s11 + $0xc8] sm:$0xff]  ;;  %v285_v16 = vld [vmem:[%s3147_s11 + $0x1c0] sm:$0xff] }
  0x2d   : > { %v320_v13 = vpack.c.bf16 %v284_v11, %v283_v10  ;;  %v286_v17 = vld [vmem:[%s3147_s11 + $0x1c8] sm:$0xff]  ;;  %v305_v18 = vpack.c.bf16 %v254_v15, %v253_v14  ;;  %v255_v20 = vld [vmem:[%s3147_s11 + $0xd0] sm:$0xff]  ;;  %v288_v23 = vld [vmem:[%s3147_s11 + $0x1d8] sm:$0xff] }
  0x2e   : > { %v321_v19 = vpack.c.bf16 %v286_v17, %v285_v16  ;;  %v257_v26 = vld [vmem:[%s3147_s11 + $0xe0] sm:$0xff]  ;;  %v290_v29 = vld [vmem:[%s3147_s11 + $0x1e8] sm:$0xff]  ;;  %v259_v32 = vld [vmem:[%s3147_s11 + $0xf0] sm:$0xff] }
  0x2f   : > { %v292_v35 = vld [vmem:[%s3147_s11 + $0x1f8] sm:$0xff]  ;;  %v329_v41 = vld [vmem:[%s4840_s2] sm:$0x3] }
  0x30   : > { %2480 = vmatmul.mubr.msk.bf16.gmra.mrb[8].mxu0 %vm361_vm0, %v295_v21  ;;  %2496 = vmatmul.mubr.msk.bf16.gmra.mrb[8].mxu1 %vm361_vm0, %v311_v22  ;;  %v256_v21 = vld [vmem:[%s3147_s11 + $0xd8] sm:$0xff]  ;;  %v287_v22 = vld [vmem:[%s3147_s11 + $0x1d0] sm:$0xff] }
  0x31   : > { %520 = vmatprep.mubr.bf16.mxu0 %v3050_v2  ;;  %680 = vmatprep.mubr.bf16.mxu1 %v3050_v2  ;;  %v306_v24 = vpack.c.bf16 %v256_v21, %v255_v20  ;;  %v322_v25 = vpack.c.bf16 %v288_v23, %v287_v22 }
  0x38   : > { %2481 = vmatmul.mubr.msk.bf16.gmra.mrb[12].mxu0 %vm361_vm0, %v296_v27  ;;  %2497 = vmatmul.mubr.msk.bf16.gmra.mrb[12].mxu1 %vm361_vm0, %v312_v28  ;;  %v258_v27 = vld [vmem:[%s3147_s11 + $0xe8] sm:$0xff]  ;;  %v289_v28 = vld [vmem:[%s3147_s11 + $0x1e0] sm:$0xff] }
  0x39   : > { %530 = vmatprep.mubr.bf16.mxu0 %v3050_v2  ;;  %690 = vmatprep.mubr.bf16.mxu1 %v3050_v2  ;;  %v307_v30 = vpack.c.bf16 %v258_v27, %v257_v26  ;;  %v323_v31 = vpack.c.bf16 %v290_v29, %v289_v28 }
  0x40   : > { %2482 = vmatmul.mubr.msk.bf16.gmra.mrb[16].mxu0 %vm361_vm0, %v297_v33  ;;  %2498 = vmatmul.mubr.msk.bf16.gmra.mrb[16].mxu1 %vm361_vm0, %v313_v34  ;;  %v260_v33 = vld [vmem:[%s3147_s11 + $0xf8] sm:$0xff]  ;;  %v291_v34 = vld [vmem:[%s3147_s11 + $0x1f0] sm:$0xff] }
  0x41   : > { %540 = vmatprep.mubr.bf16.mxu0 %v3050_v2  ;;  %700 = vmatprep.mubr.bf16.mxu1 %v3050_v2  ;;  %v308_v36 = vpack.c.bf16 %v260_v33, %v259_v32  ;;  %v324_v37 = vpack.c.bf16 %v292_v35, %v291_v34 }
  0x48   : > { %2483 = vmatmul.mubr.msk.bf16.gmra.mrb[20].mxu0 %vm361_vm0, %v298_v39  ;;  %2499 = vmatmul.mubr.msk.bf16.gmra.mrb[20].mxu1 %vm361_vm0, %v314_v40  ;;  %v332_v39 = vshrl.u32 %v331_v38, 7 }
  0x49   : > { %550 = vmatprep.mubr.bf16.mxu0 %v3050_v2  ;;  %710 = vmatprep.mubr.bf16.mxu1 %v3050_v2 }
  0x4a   : > { %v333_v40 = vsub.s32 0, %v332_v39  ;;  %v337_v42 = vsub.s32 1, %v332_v39 }
  0x4c   : > { %v3278_v43 = vrot.slane %v329_v41, %v333_v40  ;;  %v3280_v44 = vrot.slane %v329_v41, %v337_v42 }
  0x50   : > { %2484 = vmatmul.mubr.msk.bf16.gmra.mrb[24].mxu0 %vm361_vm0, %v299_v45  ;;  %2500 = vmatmul.mubr.msk.bf16.gmra.mrb[24].mxu1 %vm361_vm0, %v315_v46 }
  0x51   : > { %560 = vmatprep.mubr.bf16.mxu0 %v3050_v2  ;;  %720 = vmatprep.mubr.bf16.mxu1 %v3050_v2 }
  0x58   : > { %2485 = vmatmul.mubr.msk.bf16.gmra.mrb[28].mxu0 %vm361_vm0, %v300_v51  ;;  %2501 = vmatmul.mubr.msk.bf16.gmra.mrb[28].mxu1 %vm361_vm0, %v316_v52 }
  0x59   : > { %570 = vmatprep.mubr.bf16.mxu0 %v3050_v2  ;;  %730 = vmatprep.mubr.bf16.mxu1 %v3050_v2 }
  0x60   : > { %2486 = vmatmul.mubr.msk.bf16.gmra.mrb[32].mxu0 %vm361_vm0, %v301_v57  ;;  %2502 = vmatmul.mubr.msk.bf16.gmra.mrb[32].mxu1 %vm361_vm0, %v317_v58 }
  0x61   : > { %580 = vmatprep.mubr.bf16.mxu0 %v3050_v2  ;;  %740 = vmatprep.mubr.bf16.mxu1 %v3050_v2 }
  0x68   : > { %2487 = vmatmul.mubr.msk.bf16.gmra.mrb[36].mxu0 %vm361_vm0, %v302_v63  ;;  %2503 = vmatmul.mubr.msk.bf16.gmra.mrb[36].mxu1 %vm361_vm0, %v318_v0 }
  0x69   : > { %590 = vmatprep.mubr.bf16.mxu0 %v3050_v2  ;;  %750 = vmatprep.mubr.bf16.mxu1 %v3050_v2 }
  0x70   : > { %2488 = vmatmul.mubr.msk.bf16.gmra.mrb[40].mxu0 %vm361_vm0, %v303_v6  ;;  %2504 = vmatmul.mubr.msk.bf16.gmra.mrb[40].mxu1 %vm361_vm0, %v319_v7 }
  0x71   : > { %600 = vmatprep.mubr.bf16.mxu0 %v3050_v2  ;;  %760 = vmatprep.mubr.bf16.mxu1 %v3050_v2 }
  0x78   : > { %2489 = vmatmul.mubr.msk.bf16.gmra.mrb[44].mxu0 %vm361_vm0, %v304_v12  ;;  %2505 = vmatmul.mubr.msk.bf16.gmra.mrb[44].mxu1 %vm361_vm0, %v320_v13 }
  0x79   : > { %610 = vmatprep.mubr.bf16.mxu0 %v3050_v2  ;;  %770 = vmatprep.mubr.bf16.mxu1 %v3050_v2 }
  0x80   : > { %2490 = vmatmul.mubr.msk.bf16.gmra.mrb[48].mxu0 %vm361_vm0, %v305_v18  ;;  %2506 = vmatmul.mubr.msk.bf16.gmra.mrb[48].mxu1 %vm361_vm0, %v321_v19 }
  0x81   : > { %620 = vmatprep.mubr.bf16.mxu0 %v3050_v2  ;;  %780 = vmatprep.mubr.bf16.mxu1 %v3050_v2 }
  0x88   : > { %2491 = vmatmul.mubr.msk.bf16.gmra.mrb[52].mxu0 %vm361_vm0, %v306_v24  ;;  %2507 = vmatmul.mubr.msk.bf16.gmra.mrb[52].mxu1 %vm361_vm0, %v322_v25 }
  0x89   : > { %630 = vmatprep.mubr.bf16.mxu0 %v3050_v2  ;;  %790 = vmatprep.mubr.bf16.mxu1 %v3050_v2 }
  0x90   : > { %2492 = vmatmul.mubr.msk.bf16.gmra.mrb[56].mxu0 %vm361_vm0, %v307_v30  ;;  %2508 = vmatmul.mubr.msk.bf16.gmra.mrb[56].mxu1 %vm361_vm0, %v323_v31 }
  0x91   : > { %640 = vmatprep.mubr.bf16.mxu0 %v3050_v2  ;;  %800 = vmatprep.mubr.bf16.mxu1 %v3050_v2 }
  0x98   : > { %2493 = vmatmul.mubr.msk.bf16.gmra.mrb[60].mxu0 %vm361_vm0, %v308_v36  ;;  %2509 = vmatmul.mubr.msk.bf16.gmra.mrb[60].mxu1 %vm361_vm0, %v324_v37 }
  0xf3   : > { %v492_v2 = vpop.f32.mrb[0].mxu0  ;;  %v652_v46 = vpop.f32.mrb[0].mxu1 }
  0xf4   : > { %v3283_v45 = vadd.f32 %v492_v2, %v3278_v43  ;;  %v494_v47 = vpop.f32.mrb[1].mxu0  ;;  %v3286_v48 = vadd.f32 %v652_v46, %v3278_v43  ;;  %v654_v50 = vpop.f32.mrb[1].mxu1 }
  0xf5   : > { %v3289_v49 = vadd.f32 %v494_v47, %v3280_v44  ;;  %v496_v51 = vpop.f32.mrb[2].mxu0  ;;  %v3294_v53 = vadd.f32 %v654_v50, %v3280_v44  ;;  %v656_v55 = vpop.f32.mrb[2].mxu1 }
  0xf6   : > { %v811_v52 = vmul.f32 %v3283_v45, %v3283_v45  ;;  %v3297_v54 = vadd.f32 %v496_v51, %v3278_v43  ;;  %v498_v56 = vpop.f32.mrb[3].mxu0  ;;  %v875_v57 = vmul.f32 %v3286_v48, %v3286_v48  ;;  %v3304_v59 = vadd.f32 %v656_v55, %v3278_v43  ;;  %v658_v61 = vpop.f32.mrb[3].mxu1 }
  0xf7   : > { %v812_v58 = vmul.f32 %v3289_v49, %v3289_v49  ;;  %v3307_v60 = vadd.f32 %v498_v56, %v3280_v44  ;;  %v876_v63 = vmul.f32 %v3294_v53, %v3294_v53  ;;  %v3315_v1 = vadd.f32 %v658_v61, %v3280_v44 }
  0xf8   : > { %v939_v62 = vmul.f32 %v811_v52, %v3283_v45  ;;  %v813_v0 = vmul.f32 %v3297_v54, %v3297_v54  ;;  %v1003_v3 = vmul.f32 %v875_v57, %v3286_v48  ;;  %v877_v5 = vmul.f32 %v3304_v59, %v3304_v59 }
  0xf9   : > { %v940_v4 = vmul.f32 %v812_v58, %v3289_v49  ;;  %v814_v6 = vmul.f32 %v3307_v60, %v3307_v60  ;;  %v1004_v8 = vmul.f32 %v876_v63, %v3294_v53  ;;  %v878_v10 = vmul.f32 %v3315_v1, %v3315_v1 }
  0xfa   : > { %v1067_v7 = vmul.f32 0.044715, %v939_v62  ;;  %v941_v9 = vmul.f32 %v813_v0, %v3297_v54  ;;  %v1131_v11 = vmul.f32 0.044715, %v1003_v3  ;;  %v1005_v13 = vmul.f32 %v877_v5, %v3304_v59 }
  0xfb   : > { %v1068_v12 = vmul.f32 0.044715, %v940_v4  ;;  %v942_v14 = vmul.f32 %v814_v6, %v3307_v60  ;;  %v502_v15 = vpop.f32.mrb[4].mxu0  ;;  %v1132_v17 = vmul.f32 0.044715, %v1004_v8  ;;  %v1006_v19 = vmul.f32 %v878_v10, %v3315_v1  ;;  %v662_v20 = vpop.f32.mrb[4].mxu1 }
  0xfc   : > { %v1195_v16 = vadd.f32 %v1067_v7, %v3283_v45  ;;  %v1069_v18 = vmul.f32 0.044715, %v941_v9  ;;  %v504_v21 = vpop.f32.mrb[5].mxu0  ;;  %v1259_v22 = vadd.f32 %v1131_v11, %v3286_v48  ;;  %v1133_v24 = vmul.f32 0.044715, %v1005_v13  ;;  %v664_v26 = vpop.f32.mrb[5].mxu1 }
  0xfd   : > { %v1196_v23 = vadd.f32 %v1068_v12, %v3289_v49  ;;  %v1070_v25 = vmul.f32 0.044715, %v942_v14  ;;  %v506_v27 = vpop.f32.mrb[6].mxu0  ;;  %v1260_v29 = vadd.f32 %v1132_v17, %v3294_v53  ;;  %v1134_v31 = vmul.f32 0.044715, %v1006_v19  ;;  %v666_v32 = vpop.f32.mrb[6].mxu1 }
  0xfe   : > { %v1323_v28 = vmul.f32 0.7978846, %v1195_v16  ;;  %v1197_v30 = vadd.f32 %v1069_v18, %v3297_v54  ;;  %v508_v33 = vpop.f32.mrb[7].mxu0  ;;  %v1387_v34 = vmul.f32 0.7978846, %v1259_v22  ;;  %v1261_v36 = vadd.f32 %v1133_v24, %v3304_v59  ;;  %v668_v38 = vpop.f32.mrb[7].mxu1 }
  0xff   : > { %v1324_v35 = vmul.f32 0.7978846, %v1196_v23  ;;  %v1198_v37 = vadd.f32 %v1070_v25, %v3307_v60  ;;  %v1388_v39 = vmul.f32 0.7978846, %v1260_v29  ;;  %v1262_v41 = vadd.f32 %v1134_v31, %v3315_v1 }
 0x100   : > { %2714 = vtanh.f32 %v1323_v28  ;;  %v1325_v40 = vmul.f32 0.7978846, %v1197_v30  ;;  %v1389_v42 = vmul.f32 0.7978846, %v1261_v36  ;;  %v3339_v46 = vadd.f32 %v502_v15, %v3278_v43 }
 0x101   : > { %2716 = vtanh.f32 %v1387_v34  ;;  %v1326_v2 = vmul.f32 0.7978846, %v1198_v37  ;;  %v1390_v47 = vmul.f32 0.7978846, %v1262_v41  ;;  %v3342_v50 = vadd.f32 %v662_v20, %v3278_v43 }
 0x102   : > { %2718 = vtanh.f32 %v1324_v35  ;;  %v3345_v51 = vadd.f32 %v504_v21, %v3280_v44  ;;  %v815_v52 = vmul.f32 %v3339_v46, %v3339_v46  ;;  %v3350_v55 = vadd.f32 %v664_v26, %v3280_v44 }
 0x103   : > { %2720 = vtanh.f32 %v1388_v39  ;;  %v3353_v56 = vadd.f32 %v506_v27, %v3278_v43  ;;  %v3355_v57 = vpop.f32.mrb[8].mxu0  ;;  %v879_v58 = vmul.f32 %v3342_v50, %v3342_v50  ;;  %v3362_v62 = vadd.f32 %v666_v32, %v3278_v43  ;;  %v3364_v63 = vpop.f32.mrb[8].mxu1 }
 0x104   : > { %2722 = vtanh.f32 %v1325_v40  ;;  %v816_v61 = vmul.f32 %v3345_v51, %v3345_v51  ;;  %v3366_v0 = vpop.f32.mrb[9].mxu0  ;;  %v943_v3 = vmul.f32 %v815_v52, %v3339_v46  ;;  %v880_v4 = vmul.f32 %v3350_v55, %v3350_v55  ;;  %v3373_v6 = vpop.f32.mrb[9].mxu1 }
 0x105   : > { %2724 = vtanh.f32 %v1389_v42  ;;  %v817_v5 = vmul.f32 %v3353_v56, %v3353_v56  ;;  %v3375_v7 = vpop.f32.mrb[10].mxu0  ;;  %v1007_v8 = vmul.f32 %v879_v58, %v3342_v50  ;;  %v881_v10 = vmul.f32 %v3362_v62, %v3362_v62  ;;  %v3381_v11 = vpop.f32.mrb[10].mxu1 }
 0x106   : > { %2726 = vtanh.f32 %v1326_v2  ;;  %v944_v9 = vmul.f32 %v816_v61, %v3345_v51  ;;  %v3383_v12 = vpop.f32.mrb[11].mxu0  ;;  %v1071_v13 = vmul.f32 0.044715, %v943_v3  ;;  %v1008_v14 = vmul.f32 %v880_v4, %v3350_v55  ;;  %v3387_v16 = vpop.f32.mrb[11].mxu1 }
 0x107   : > { %2728 = vtanh.f32 %v1390_v47  ;;  %v945_v15 = vmul.f32 %v817_v5, %v3353_v56  ;;  %v1135_v17 = vmul.f32 0.044715, %v1007_v8  ;;  %v1009_v19 = vmul.f32 %v881_v10, %v3362_v62 }
 0x108   : > { %v1072_v18 = vmul.f32 0.044715, %v944_v9  ;;  %v3392_v20 = vadd.f32 %v508_v33, %v3280_v44  ;;  %v1199_v21 = vadd.f32 %v1071_v13, %v3339_v46  ;;  %v1136_v22 = vmul.f32 0.044715, %v1008_v14 }
 0x109   : > { %v1073_v23 = vmul.f32 0.044715, %v945_v15  ;;  %v3396_v24 = vadd.f32 %v668_v38, %v3280_v44  ;;  %v1263_v26 = vadd.f32 %v1135_v17, %v3342_v50  ;;  %v1137_v28 = vmul.f32 0.044715, %v1009_v19 }
 0x10a   : > { %v2715_v25 = vpop.eup %2714  ;;  %v1200_v27 = vadd.f32 %v1072_v18, %v3345_v51  ;;  %v3402_v29 = vmul.f32 %v3392_v20, %v3392_v20  ;;  %v1327_v32 = vmul.f32 0.7978846, %v1199_v21  ;;  %v1264_v33 = vadd.f32 %v1136_v22, %v3350_v55 }
 0x10b   : > { %v2717_v30 = vpop.eup %2716  ;;  %v1579_v31 = vadd.f32 1.0, %v2715_v25  ;;  %v1201_v34 = vadd.f32 %v1073_v23, %v3353_v56  ;;  %v3410_v35 = vpop.f32.mrb[12].mxu0  ;;  %v1391_v38 = vmul.f32 0.7978846, %v1263_v26  ;;  %v1265_v40 = vadd.f32 %v1137_v28, %v3362_v62 }
 0x10c   : > { %v2719_v36 = vpop.eup %2718  ;;  %v1643_v37 = vadd.f32 1.0, %v2717_v30  ;;  %v1328_v39 = vmul.f32 0.7978846, %v1200_v27  ;;  %v3413_v41 = vpop.f32.mrb[12].mxu1  ;;  %2730 = vtanh.f32 %v1327_v32  ;;  %v1392_v52 = vmul.f32 0.7978846, %v1264_v33 }
 0x10d   : > { %v2721_v42 = vpop.eup %2720  ;;  %v1707_v2 = vmul.f32 0.5, %v1579_v31  ;;  %v1580_v47 = vadd.f32 1.0, %v2719_v36  ;;  %v3415_v58 = vpop.f32.mrb[13].mxu0  ;;  %2732 = vtanh.f32 %v1391_v38  ;;  %v1329_v8 = vmul.f32 0.7978846, %v1201_v34 }
 0x10e   : > { %v3417_v61 = vpop.f32.mrb[13].mxu1  ;;  %v2723_v3 = vpop.eup %2722  ;;  %v1771_v4 = vmul.f32 0.5, %v1643_v37  ;;  %v1644_v5 = vadd.f32 1.0, %v2721_v42  ;;  %2734 = vtanh.f32 %v1328_v39  ;;  %v1393_v42 = vmul.f32 0.7978846, %v1265_v40 }
 0x10f   : > { %v3419_v9 = vpop.f32.mrb[14].mxu0  ;;  %v3421_v10 = vpop.f32.mrb[14].mxu1  ;;  %v1835_v14 = vmul.f32 %v1707_v2, %v3283_v45  ;;  %v1708_v15 = vmul.f32 0.5, %v1580_v47  ;;  %v1581_v17 = vadd.f32 1.0, %v2723_v3  ;;  %2736 = vtanh.f32 %v1392_v52 }
 0x110   : > { %v2725_v13 = vpop.eup %2724  ;;  %v3424_v18 = vpop.f32.mrb[15].mxu0  ;;  %v1899_v22 = vmul.f32 %v1771_v4, %v3286_v48  ;;  %v1772_v23 = vmul.f32 0.5, %v1644_v5  ;;  %2738 = vtanh.f32 %v1329_v8  ;;  %v946_v3 = vmul.f32 %v3402_v29, %v3392_v20 }
 0x111   : > { %v3426_v19 = vpop.f32.mrb[15].mxu1  ;;  %v2727_v21 = vpop.eup %2726  ;;  %v1645_v25 = vadd.f32 1.0, %v2725_v13  ;;  %v2510_v27 = vclamps-f32 %v1835_v14, 5.0  ;;  %v1836_v28 = vmul.f32 %v1708_v15, %v3289_v49  ;;  %v1709_v30 = vmul.f32 0.5, %v1581_v17 }
 0x112   : > { %v2729_v26 = vpop.eup %2728  ;;  %v1582_v45 = vadd.f32 1.0, %v2727_v21  ;;  %v2574_v31 = vclamps-f32 %v1899_v22, 5.0  ;;  %v1900_v32 = vmul.f32 %v1772_v23, %v3294_v53  ;;  %v882_v4 = vmul.f32 %v3396_v24, %v3396_v24 }
 0x113   : > { %v1773_v33 = vmul.f32 0.5, %v1645_v25  ;;  %v1646_v34 = vadd.f32 1.0, %v2729_v26  ;;  %2219 = vst [vmem:[%s3432_s26] sm:$0xff] %v2510_v27  ;;  %v2511_v48 = vclamps-f32 %v1836_v28, 5.0  ;;  %v1837_v36 = vmul.f32 %v1709_v30, %v3297_v54  ;;  %v3436_v49 = vpop.f32.mrb[16].mxu0  ;;  %v3440_v2 = vpop.f32.mrb[16].mxu1 }
 0x114   : > { %v1710_v37 = vmul.f32 0.5, %v1582_v45  ;;  %2283 = vst [vmem:[%s3432_s26 + $0x200] sm:$0xff] %v2574_v31  ;;  %v2575_v38 = vclamps-f32 %v1900_v32, 5.0  ;;  %v3442_v47 = vpop.f32.mrb[17].mxu0  ;;  %v3450_v5 = vpop.f32.mrb[17].mxu1  ;;  %2740 = vtanh.f32 %v1393_v42  ;;  %v3458_v13 = vadd.f32 %v3355_v57, %v3278_v43 }
 0x115   : > { %v1901_v53 = vmul.f32 %v1773_v33, %v3304_v59  ;;  %v1774_v39 = vmul.f32 0.5, %v1646_v34  ;;  %2220 = vst [vmem:[%s3432_s26 + $0x8] sm:$0xff] %v2511_v48  ;;  %v2512_v52 = vclamps-f32 %v1837_v36, 5.0  ;;  %v3452_v59 = vpop.f32.mrb[18].mxu0  ;;  %v1074_v17 = vmul.f32 0.044715, %v946_v3 }
 0x116   : > { %v1838_v54 = vmul.f32 %v1710_v37, %v3307_v60  ;;  %2284 = vst [vmem:[%s3432_s26 + $0x208] sm:$0xff] %v2575_v38  ;;  %v3460_v60 = vpop.f32.mrb[18].mxu1  ;;  %v3462_v29 = vpop.f32.mrb[19].mxu0  ;;  %v1010_v21 = vmul.f32 %v882_v4, %v3396_v24  ;;  %v819_v26 = vmul.f32 %v3458_v13, %v3458_v13  ;;  %v3477_v27 = vadd.f32 %v3366_v0, %v3280_v44 }
 0x117   : > { %v2576_v40 = vclamps-f32 %v1901_v53, 5.0  ;;  %v1902_v8 = vmul.f32 %v1774_v39, %v3315_v1  ;;  %v2731_v14 = vpop.eup %2730  ;;  %2221 = vst [vmem:[%s3432_s26 + $0x10] sm:$0xff] %v2512_v52  ;;  %v3468_v1 = vadd.f32 %v3364_v63, %v3278_v43  ;;  %v3470_v22 = vpop.f32.mrb[19].mxu1  ;;  %v1202_v45 = vadd.f32 %v1074_v17, %v3392_v20 }
 0x118   : > { %v2513_v15 = vclamps-f32 %v1838_v54, 5.0  ;;  %v2733_v57 = vpop.eup %2732  ;;  %v1583_v25 = vadd.f32 1.0, %v2731_v14  ;;  %v1138_v63 = vmul.f32 0.044715, %v1010_v21  ;;  %v947_v48 = vmul.f32 %v819_v26, %v3458_v13 }
 0x119   : > { %2285 = vst [vmem:[%s3432_s26 + $0x210] sm:$0xff] %v2576_v40  ;;  %v2577_v23 = vclamps-f32 %v1902_v8, 5.0  ;;  %v2735_v28 = vpop.eup %2734  ;;  %v1647_v30 = vadd.f32 1.0, %v2733_v57  ;;  %v883_v31 = vmul.f32 %v3468_v1, %v3468_v1  ;;  %v820_v36 = vmul.f32 %v3477_v27, %v3477_v27 }
 0x11a   : > { %2222 = vst [vmem:[%s3432_s26 + $0x18] sm:$0xff] %v2513_v15  ;;  %v2737_v32 = vpop.eup %2736  ;;  %v1711_v33 = vmul.f32 0.5, %v1583_v25  ;;  %v1584_v34 = vadd.f32 1.0, %v2735_v28  ;;  %v1330_v38 = vmul.f32 0.7978846, %v1202_v45  ;;  %v1266_v53 = vadd.f32 %v1138_v63, %v3396_v24 }
 0x11b   : > { %2286 = vst [vmem:[%s3432_s26 + $0x218] sm:$0xff] %v2577_v23  ;;  %v1775_v0 = vmul.f32 0.5, %v1647_v30  ;;  %v1648_v37 = vadd.f32 1.0, %v2737_v32  ;;  %v3488_v39 = vpop.f32.mrb[20].mxu0  ;;  %v1075_v54 = vmul.f32 0.044715, %v947_v48  ;;  %v1011_v3 = vmul.f32 %v883_v31, %v3468_v1  ;;  %v2739_v8 = vpop.eup %2738 }
 0x11c   : > { %v1839_v42 = vmul.f32 %v1711_v33, %v3339_v46  ;;  %v1712_v52 = vmul.f32 0.5, %v1584_v34  ;;  %v3492_v4 = vpop.f32.mrb[20].mxu1  ;;  %v3494_v40 = vpop.f32.mrb[21].mxu0  ;;  %2742 = vtanh.f32 %v1330_v38  ;;  %v1394_v17 = vmul.f32 0.7978846, %v1266_v53 }
 0x11d   : > { %v1903_v14 = vmul.f32 %v1775_v0, %v3342_v50  ;;  %v1776_v15 = vmul.f32 0.5, %v1648_v37  ;;  %v3497_v21 = vpop.f32.mrb[21].mxu1  ;;  %v3499_v57 = vpop.f32.mrb[22].mxu0  ;;  %v1585_v25 = vadd.f32 1.0, %v2739_v8  ;;  %v1203_v26 = vadd.f32 %v1075_v54, %v3458_v13 }
 0x11e   : > { %v2514_v46 = vclamps-f32 %v1839_v42, 5.0  ;;  %v1840_v23 = vmul.f32 %v1712_v52, %v3345_v51  ;;  %v3503_v28 = vpop.f32.mrb[22].mxu1  ;;  %v3505_v30 = vpop.f32.mrb[23].mxu0  ;;  %2744 = vtanh.f32 %v1394_v17  ;;  %v1139_v63 = vmul.f32 0.044715, %v1011_v3 }
 0x11f   : > { %v2578_v50 = vclamps-f32 %v1903_v14, 5.0  ;;  %v1904_v45 = vmul.f32 %v1776_v15, %v3350_v55  ;;  %v3508_v31 = vpop.f32.mrb[23].mxu1  ;;  %v2741_v32 = vpop.eup %2740  ;;  %v1713_v33 = vmul.f32 0.5, %v1585_v25  ;;  %v1331_v34 = vmul.f32 0.7978846, %v1203_v26 }
 0x120   : > { %2223 = vst [vmem:[%s3432_s26 + $0x20] sm:$0xff] %v2514_v46  ;;  %v2515_v51 = vclamps-f32 %v1840_v23, 5.0  ;;  %v948_v48 = vmul.f32 %v820_v36, %v3477_v27  ;;  %v1649_v37 = vadd.f32 1.0, %v2741_v32  ;;  %v1267_v38 = vadd.f32 %v1139_v63, %v3468_v1 }
 0x121   : > { %2287 = vst [vmem:[%s3432_s26 + $0x220] sm:$0xff] %v2578_v50  ;;  %v2579_v0 = vclamps-f32 %v1904_v45, 5.0  ;;  %v3516_v55 = vadd.f32 %v3373_v6, %v3280_v44  ;;  %v1841_v53 = vmul.f32 %v1713_v33, %v3353_v56  ;;  %2746 = vtanh.f32 %v1331_v34 }
 0x122   : > { %2224 = vst [vmem:[%s3432_s26 + $0x28] sm:$0xff] %v2515_v51  ;;  %v1076_v42 = vmul.f32 0.044715, %v948_v48  ;;  %v3522_v52 = vadd.f32 %v3375_v7, %v3278_v43  ;;  %v1777_v36 = vmul.f32 0.5, %v1649_v37  ;;  %v1395_v54 = vmul.f32 0.7978846, %v1267_v38 }
 0x123   : > { %2288 = vst [vmem:[%s3432_s26 + $0x228] sm:$0xff] %v2579_v0  ;;  %v884_v3 = vmul.f32 %v3516_v55, %v3516_v55  ;;  %v3529_v6 = vadd.f32 %v3381_v11, %v3278_v43  ;;  %v3531_v8 = vpop.f32.mrb[24].mxu0  ;;  %v2516_v56 = vclamps-f32 %v1841_v53, 5.0  ;;  %v3538_v15 = vadd.f32 %v3383_v12, %v3280_v44  ;;  %v3540_v17 = vpop.f32.mrb[24].mxu1 }
 0x124   : > { %v1204_v14 = vadd.f32 %v1076_v42, %v3477_v27  ;;  %v821_v7 = vmul.f32 %v3522_v52, %v3522_v52  ;;  %v3542_v46 = vpop.f32.mrb[25].mxu0  ;;  %v1905_v23 = vmul.f32 %v1777_v36, %v3362_v62  ;;  %2748 = vtanh.f32 %v1395_v54  ;;  %v3548_v26 = vpop.f32.mrb[25].mxu1 }
 0x125   : > { %v1012_v11 = vmul.f32 %v884_v3, %v3516_v55  ;;  %v885_v25 = vmul.f32 %v3529_v6, %v3529_v6  ;;  %v3550_v50 = vpop.f32.mrb[26].mxu0  ;;  %2225 = vst [vmem:[%s3432_s26 + $0x30] sm:$0xff] %v2516_v56  ;;  %v822_v63 = vmul.f32 %v3538_v15, %v3538_v15  ;;  %v3558_v62 = vadd.f32 %v3387_v16, %v3280_v44  ;;  %v3560_v32 = vpop.f32.mrb[26].mxu1 }
 0x126   : > { %v1332_v45 = vmul.f32 0.7978846, %v1204_v14  ;;  %v949_v12 = vmul.f32 %v821_v7, %v3522_v52  ;;  %v3562_v51 = vpop.f32.mrb[27].mxu0  ;;  %v2743_v33 = vpop.eup %2742  ;;  %v2580_v34 = vclamps-f32 %v1905_v23, 5.0  ;;  %v3567_v37 = vadd.f32 %v3410_v35, %v3278_v43 }
 0x127   : > { %v1140_v48 = vmul.f32 0.044715, %v1012_v11  ;;  %v1013_v0 = vmul.f32 %v885_v25, %v3529_v6  ;;  %v3569_v38 = vpop.f32.mrb[27].mxu1  ;;  %v1586_v53 = vadd.f32 1.0, %v2743_v33  ;;  %v950_v16 = vmul.f32 %v822_v63, %v3538_v15 }
 0x128   : > { %4844 = vst [vmem:[#allocation5_spill] sm:$0xff] %v3569_v38  ;;  %2750 = vtanh.f32 %v1332_v45  ;;  %v1077_v42 = vmul.f32 0.044715, %v949_v12  ;;  %v2745_v36 = vpop.eup %2744  ;;  %2289 = vst [vmem:[%s3432_s26 + $0x230] sm:$0xff] %v2580_v34  ;;  %v886_v56 = vmul.f32 %v3558_v62, %v3558_v62  ;;  %v823_v14 = vmul.f32 %v3567_v37, %v3567_v37 }
 0x129   : > { %v1268_v54 = vadd.f32 %v1140_v48, %v3516_v55  ;;  %v1141_v3 = vmul.f32 0.044715, %v1013_v0  ;;  %v1714_v35 = vmul.f32 0.5, %v1586_v53  ;;  %v1650_v7 = vadd.f32 1.0, %v2745_v36 }
 0x12a   : > { %v1205_v23 = vadd.f32 %v1077_v42, %v3522_v52  ;;  %v1078_v11 = vmul.f32 0.044715, %v950_v16  ;;  %v1014_v12 = vmul.f32 %v886_v56, %v3558_v62  ;;  %v951_v63 = vmul.f32 %v823_v14, %v3567_v37 }
 0x12b   : > { %v1396_v25 = vmul.f32 0.7978846, %v1268_v54  ;;  %v1269_v45 = vadd.f32 %v1141_v3, %v3529_v6  ;;  %v3582_v33 = vpop.f32.mrb[28].mxu0  ;;  %v2747_v34 = vpop.eup %2746  ;;  %v1842_v48 = vmul.f32 %v1714_v35, %v3392_v20  ;;  %v1778_v0 = vmul.f32 0.5, %v1650_v7 }
 0x12c   : > { %4845 = vst [vmem:[#allocation6_spill] sm:$0xff] %v3582_v33  ;;  %v1333_v38 = vmul.f32 0.7978846, %v1205_v23  ;;  %v1206_v53 = vadd.f32 %v1078_v11, %v3538_v15  ;;  %v3586_v36 = vpop.f32.mrb[28].mxu1  ;;  %v3588_v42 = vpop.f32.mrb[29].mxu0  ;;  %v1587_v16 = vadd.f32 1.0, %v2747_v34 }
 0x12d   : > { %2752 = vtanh.f32 %v1396_v25  ;;  %v1397_v54 = vmul.f32 0.7978846, %v1269_v45  ;;  %v1142_v3 = vmul.f32 0.044715, %v1014_v12  ;;  %v3590_v56 = vpop.f32.mrb[29].mxu1  ;;  %v2517_v14 = vclamps-f32 %v1842_v48, 5.0 }
 0x12e   : > { %4846 = vst [vmem:[#allocation7_spill] sm:$0xff] %v3590_v56  ;;  %v1906_v33 = vmul.f32 %v1778_v0, %v3396_v24  ;;  %2754 = vtanh.f32 %v1333_v38  ;;  %v1334_v20 = vmul.f32 0.7978846, %v1206_v53  ;;  %v3593_v35 = vpop.f32.mrb[30].mxu0  ;;  %v3595_v7 = vpop.f32.mrb[30].mxu1  ;;  %v1715_v11 = vmul.f32 0.5, %v1587_v16 }
 0x12f   : > { %4847 = vst [vmem:[#allocation8_spill] sm:$0xff] %v3593_v35  ;;  %4848 = vst [vmem:[#allocation9_spill] sm:$0xff] %v3595_v7  ;;  %v2749_v23 = vpop.eup %2748  ;;  %2756 = vtanh.f32 %v1397_v54  ;;  %v1270_v25 = vadd.f32 %v1142_v3, %v3558_v62  ;;  %v1079_v45 = vmul.f32 0.044715, %v951_v63  ;;  %v3598_v34 = vpop.f32.mrb[31].mxu0  ;;  %v3605_v38 = vadd.f32 %v3413_v41, %v3278_v43 }
 0x130   : > { %4849 = vst [vmem:[#allocation10_spill] sm:$0xff] %v3598_v34  ;;  %v3600_v12 = vpop.f32.mrb[31].mxu1  ;;  %2226 = vst [vmem:[%s3432_s26 + $0x38] sm:$0xff] %v2517_v14  ;;  %v2581_v48 = vclamps-f32 %v1906_v33, 5.0  ;;  %v1651_v24 = vadd.f32 1.0, %v2749_v23  ;;  %2758 = vtanh.f32 %v1334_v20  ;;  %v1843_v0 = vmul.f32 %v1715_v11, %v3458_v13 }
 0x131   : > { %4850 = vst [vmem:[#allocation11_spill] sm:$0xff] %v3600_v12  ;;  %v1398_v53 = vmul.f32 0.7978846, %v1270_v25  ;;  %v1207_v16 = vadd.f32 %v1079_v45, %v3567_v37  ;;  %v3611_v63 = vadd.f32 %v3415_v58, %v3280_v44  ;;  %v887_v33 = vmul.f32 %v3605_v38, %v3605_v38 }
 0x132   : > { %v2751_v54 = vpop.eup %2750  ;;  %2290 = vst [vmem:[%s3432_s26 + $0x238] sm:$0xff] %v2581_v48  ;;  %v1779_v3 = vmul.f32 0.5, %v1651_v24  ;;  %v3618_v41 = vadd.f32 %v3417_v61, %v3280_v44  ;;  %v3622_v13 = vadd.f32 %v3419_v9, %v3278_v43  ;;  %v2518_v14 = vclamps-f32 %v1843_v0, 5.0 }
 0x133   : > { %v1588_v20 = vadd.f32 1.0, %v2751_v54  ;;  %2760 = vtanh.f32 %v1398_v53  ;;  %v1335_v58 = vmul.f32 0.7978846, %v1207_v16  ;;  %v3624_v23 = vpop.f32.mrb[32].mxu0  ;;  %v1015_v25 = vmul.f32 %v887_v33, %v3605_v38  ;;  %v3632_v48 = vpop.f32.mrb[32].mxu1 }
 0x134   : > { %4851 = vst [vmem:[#allocation12_spill] sm:$0xff] %v3624_v23  ;;  %v1907_v11 = vmul.f32 %v1779_v3, %v3468_v1  ;;  %v824_v45 = vmul.f32 %v3611_v63, %v3611_v63  ;;  %v888_v61 = vmul.f32 %v3618_v41, %v3618_v41  ;;  %4852 = vst [vmem:[#allocation13_spill] sm:$0xff] %v3632_v48  ;;  %v3634_v9 = vpop.f32.mrb[33].mxu0  ;;  %v3643_v53 = vpop.f32.mrb[33].mxu1 }
 0x135   : > { %4853 = vst [vmem:[#allocation14_spill] sm:$0xff] %v3634_v9  ;;  %2227 = vst [vmem:[%s3432_s26 + $0x40] sm:$0xff] %v2518_v14  ;;  %v1716_v24 = vmul.f32 0.5, %v1588_v20  ;;  %2762 = vtanh.f32 %v1335_v58  ;;  %v825_v0 = vmul.f32 %v3622_v13, %v3622_v13  ;;  %v3641_v1 = vadd.f32 %v3421_v10, %v3278_v43  ;;  %v3645_v16 = vpop.f32.mrb[34].mxu0  ;;  %v3649_v20 = vpop.f32.mrb[34].mxu1 }
 0x136   : > { %4854 = vst [vmem:[#allocation15_spill] sm:$0xff] %v3643_v53  ;;  %4855 = vst [vmem:[#allocation16_spill] sm:$0xff] %v3645_v16  ;;  %v2582_v54 = vclamps-f32 %v1907_v11, 5.0  ;;  %v1143_v3 = vmul.f32 0.044715, %v1015_v25  ;;  %v952_v33 = vmul.f32 %v824_v45, %v3611_v63  ;;  %v1016_v14 = vmul.f32 %v888_v61, %v3618_v41  ;;  %v3651_v58 = vpop.f32.mrb[35].mxu0 }
 0x137   : > { %4856 = vst [vmem:[#allocation17_spill] sm:$0xff] %v3649_v20  ;;  %4857 = vst [vmem:[#allocation18_spill] sm:$0xff] %v3651_v58  ;;  %v2753_v9 = vpop.eup %2752  ;;  %v1844_v48 = vmul.f32 %v1716_v24, %v3477_v27  ;;  %v953_v10 = vmul.f32 %v825_v0, %v3622_v13  ;;  %v889_v53 = vmul.f32 %v3641_v1, %v3641_v1  ;;  %v3661_v25 = vpop.f32.mrb[35].mxu1 }
 0x138   : > { %v3659_v11 = vadd.f32 %v3424_v18, %v3280_v44  ;;  %4858 = vst [vmem:[#allocation19_spill] sm:$0xff] %v3661_v25  ;;  %v2755_v45 = vpop.eup %2754  ;;  %2291 = vst [vmem:[%s3432_s26 + $0x240] sm:$0xff] %v2582_v54  ;;  %v1652_v61 = vadd.f32 1.0, %v2753_v9  ;;  %v1271_v58 = vadd.f32 %v1143_v3, %v3605_v38  ;;  %v1080_v20 = vmul.f32 0.044715, %v952_v33 }
 0x139   : > { %v1144_v16 = vmul.f32 0.044715, %v1016_v14  ;;  %v2757_v27 = vpop.eup %2756  ;;  %v2519_v24 = vclamps-f32 %v1844_v48, 5.0  ;;  %v1589_v0 = vadd.f32 1.0, %v2755_v45  ;;  %v1081_v23 = vmul.f32 0.044715, %v953_v10 }
 0x13a   : > { %v1017_v12 = vmul.f32 %v889_v53, %v3641_v1  ;;  %v2759_v34 = vpop.eup %2758  ;;  %v1780_v7 = vmul.f32 0.5, %v1652_v61  ;;  %v1653_v18 = vadd.f32 1.0, %v2757_v27  ;;  %v1399_v35 = vmul.f32 0.7978846, %v1271_v58 }
 0x13b   : > { %v1208_v25 = vadd.f32 %v1080_v20, %v3611_v63  ;;  %2228 = vst [vmem:[%s3432_s26 + $0x48] sm:$0xff] %v2519_v24  ;;  %v1717_v56 = vmul.f32 0.5, %v1589_v0  ;;  %v1590_v54 = vadd.f32 1.0, %v2759_v34  ;;  %v1272_v9 = vadd.f32 %v1144_v16, %v3618_v41  ;;  %v3670_v33 = vpop.f32.mrb[36].mxu0  ;;  %v3673_v10 = vpop.f32.mrb[36].mxu1 }
 0x13c   : > { %v1209_v3 = vadd.f32 %v1081_v23, %v3622_v13  ;;  %v1908_v48 = vmul.f32 %v1780_v7, %v3516_v55  ;;  %v1781_v14 = vmul.f32 0.5, %v1653_v18  ;;  %2764 = vtanh.f32 %v1399_v35  ;;  %v3675_v45 = vpop.f32.mrb[37].mxu0  ;;  %v3678_v27 = vpop.f32.mrb[37].mxu1 }
 0x13d   : > { %v1336_v53 = vmul.f32 0.7978846, %v1208_v25  ;;  %v2761_v58 = vpop.eup %2760  ;;  %v1845_v20 = vmul.f32 %v1717_v56, %v3522_v52  ;;  %v1718_v61 = vmul.f32 0.5, %v1590_v54  ;;  %v1400_v34 = vmul.f32 0.7978846, %v1272_v9  ;;  %v3681_v35 = vpop.f32.mrb[38].mxu0 }
 0x13e   : > { %v1337_v16 = vmul.f32 0.7978846, %v1209_v3  ;;  %v2583_v23 = vclamps-f32 %v1908_v48, 5.0  ;;  %v1909_v24 = vmul.f32 %v1781_v14, %v3529_v6  ;;  %v1654_v55 = vadd.f32 1.0, %v2761_v58  ;;  %v3683_v7 = vpop.f32.mrb[38].mxu1  ;;  %v3686_v18 = vpop.f32.mrb[39].mxu0 }
 0x13f   : > { %2766 = vtanh.f32 %v1336_v53  ;;  %v2763_v25 = vpop.eup %2762  ;;  %v2520_v0 = vclamps-f32 %v1845_v20, 5.0  ;;  %v1846_v52 = vmul.f32 %v1718_v61, %v3538_v15  ;;  %v1145_v56 = vmul.f32 0.044715, %v1017_v12  ;;  %4859 = vst [vmem:[#allocation20_spill] sm:$0xff] %v3686_v18  ;;  %v3688_v54 = vpop.f32.mrb[39].mxu1 }
 0x140   : > { %2768 = vtanh.f32 %v1400_v34  ;;  %4860 = vst [vmem:[#allocation21_spill] sm:$0xff] %v3688_v54  ;;  %2292 = vst [vmem:[%s3432_s26 + $0x248] sm:$0xff] %v2583_v23  ;;  %v2584_v6 = vclamps-f32 %v1909_v24, 5.0  ;;  %v1782_v9 = vmul.f32 0.5, %v1654_v55  ;;  %v1591_v3 = vadd.f32 1.0, %v2763_v25 }
 0x141   : > { %2770 = vtanh.f32 %v1337_v16  ;;  %2229 = vst [vmem:[%s3432_s26 + $0x50] sm:$0xff] %v2520_v0  ;;  %v2521_v48 = vclamps-f32 %v1846_v52, 5.0  ;;  %v1273_v14 = vadd.f32 %v1145_v56, %v3641_v1  ;;  %v826_v53 = vmul.f32 %v3659_v11, %v3659_v11 }
 0x142   : > { %v3697_v15 = vadd.f32 %v3426_v19, %v3280_v44  ;;  %2293 = vst [vmem:[%s3432_s26 + $0x250] sm:$0xff] %v2584_v6  ;;  %v1910_v12 = vmul.f32 %v1782_v9, %v3558_v62  ;;  %v1719_v58 = vmul.f32 0.5, %v1591_v3  ;;  %v3703_v20 = vadd.f32 %v3436_v49, %v3278_v43 }
 0x143   : > { %v3707_v61 = vadd.f32 %v3440_v2, %v3278_v43  ;;  %2230 = vst [vmem:[%s3432_s26 + $0x58] sm:$0xff] %v2521_v48  ;;  %v1401_v34 = vmul.f32 0.7978846, %v1273_v14  ;;  %v954_v16 = vmul.f32 %v826_v53, %v3659_v11  ;;  %v3715_v62 = vadd.f32 %v3442_v47, %v3280_v44  ;;  %v3732_v9 = vpop.f32.mrb[40].mxu0  ;;  %v3734_v3 = vpop.f32.mrb[40].mxu1 }
 0x144   : > { %v890_v19 = vmul.f32 %v3697_v15, %v3697_v15  ;;  %v2585_v23 = vclamps-f32 %v1910_v12, 5.0  ;;  %v1847_v49 = vmul.f32 %v1719_v58, %v3567_v37  ;;  %v827_v24 = vmul.f32 %v3703_v20, %v3703_v20  ;;  %4861 = vst [vmem:[#allocation22_spill] sm:$0xff] %v3732_v9  ;;  %4862 = vst [vmem:[#allocation23_spill] sm:$0xff] %v3734_v3  ;;  %v3738_v58 = vpop.f32.mrb[41].mxu0 }
 0x145   : > { %v891_v2 = vmul.f32 %v3707_v61, %v3707_v61  ;;  %2772 = vtanh.f32 %v1401_v34  ;;  %v1082_v55 = vmul.f32 0.044715, %v954_v16  ;;  %v828_v0 = vmul.f32 %v3715_v62, %v3715_v62  ;;  %4863 = vst [vmem:[#allocation24_spill] sm:$0xff] %v3738_v58 }
 0x146   : > { %v1018_v25 = vmul.f32 %v890_v19, %v3697_v15  ;;  %v2765_v52 = vpop.eup %2764  ;;  %2294 = vst [vmem:[%s3432_s26 + $0x258] sm:$0xff] %v2585_v23  ;;  %v2522_v47 = vclamps-f32 %v1847_v49, 5.0  ;;  %v955_v56 = vmul.f32 %v827_v24, %v3703_v20  ;;  %v3730_v6 = vadd.f32 %v3450_v5, %v3280_v44 }
 0x147   : > { %v1019_v37 = vmul.f32 %v891_v2, %v3707_v61  ;;  %v1655_v48 = vadd.f32 1.0, %v2765_v52  ;;  %v1210_v14 = vadd.f32 %v1082_v55, %v3659_v11  ;;  %v956_v12 = vmul.f32 %v828_v0, %v3715_v62 }
 0x148   : > { %v1146_v53 = vmul.f32 0.044715, %v1018_v25  ;;  %2231 = vst [vmem:[%s3432_s26 + $0x60] sm:$0xff] %v2522_v47  ;;  %v1083_v16 = vmul.f32 0.044715, %v955_v56  ;;  %v892_v5 = vmul.f32 %v3730_v6, %v3730_v6  ;;  %v3745_v23 = vadd.f32 %v3452_v59, %v3278_v43 }
 0x149   : > { %v2767_v34 = vpop.eup %2766  ;;  %v1147_v19 = vmul.f32 0.044715, %v1019_v37  ;;  %v1783_v24 = vmul.f32 0.5, %v1655_v48  ;;  %v1338_v55 = vmul.f32 0.7978846, %v1210_v14 }
 0x14a   : > { %v2769_v49 = vpop.eup %2768  ;;  %v1592_v2 = vadd.f32 1.0, %v2767_v34  ;;  %v1274_v25 = vadd.f32 %v1146_v53, %v3697_v15  ;;  %v1211_v58 = vadd.f32 %v1083_v16, %v3703_v20  ;;  %v1084_v56 = vmul.f32 0.044715, %v956_v12  ;;  %v3753_v16 = vpop.f32.mrb[41].mxu1 }
 0x14b   : > { %v2771_v0 = vpop.eup %2770  ;;  %v1656_v52 = vadd.f32 1.0, %v2769_v49  ;;  %v1275_v47 = vadd.f32 %v1147_v19, %v3707_v61  ;;  %v1911_v37 = vmul.f32 %v1783_v24, %v3605_v38  ;;  %2774 = vtanh.f32 %v1338_v55 }
 0x14c   : > { %v1720_v3 = vmul.f32 0.5, %v1592_v2  ;;  %v1593_v9 = vadd.f32 1.0, %v2771_v0  ;;  %v1402_v54 = vmul.f32 0.7978846, %v1274_v25  ;;  %v1339_v48 = vmul.f32 0.7978846, %v1211_v58 }
 0x14d   : > { %v1784_v59 = vmul.f32 0.5, %v1656_v52  ;;  %v1212_v14 = vadd.f32 %v1084_v56, %v3715_v62  ;;  %v2586_v34 = vclamps-f32 %v1911_v37, 5.0  ;;  %v1403_v18 = vmul.f32 0.7978846, %v1275_v47 }
 0x14e   : > { %v1848_v53 = vmul.f32 %v1720_v3, %v3611_v63  ;;  %v1721_v49 = vmul.f32 0.5, %v1593_v9  ;;  %2776 = vtanh.f32 %v1402_v54  ;;  %v1020_v19 = vmul.f32 %v892_v5, %v3730_v6  ;;  %v3761_v9 = vpop.f32.mrb[42].mxu0  ;;  %v3763_v3 = vpop.f32.mrb[42].mxu1 }
 0x14f   : > { %v1912_v12 = vmul.f32 %v1784_v59, %v3618_v41  ;;  %v1340_v38 = vmul.f32 0.7978846, %v1212_v14  ;;  %v2773_v24 = vpop.eup %2772  ;;  %2295 = vst [vmem:[%s3432_s26 + $0x260] sm:$0xff] %v2586_v34  ;;  %2778 = vtanh.f32 %v1339_v48  ;;  %v829_v63 = vmul.f32 %v3745_v23, %v3745_v23  ;;  %v3781_v56 = vpop.f32.mrb[43].mxu0 }
 0x150   : > { %v2523_v58 = vclamps-f32 %v1848_v53, 5.0  ;;  %v1849_v2 = vmul.f32 %v1721_v49, %v3622_v13  ;;  %v1657_v54 = vadd.f32 1.0, %v2773_v24  ;;  %2780 = vtanh.f32 %v1403_v18  ;;  %v3799_v53 = vpop.f32.mrb[43].mxu1 }
 0x151   : > { %v2587_v41 = vclamps-f32 %v1912_v12, 5.0  ;;  %v1148_v55 = vmul.f32 0.044715, %v1020_v19  ;;  %2782 = vtanh.f32 %v1340_v38  ;;  %v957_v25 = vmul.f32 %v829_v63, %v3745_v23 }
 0x152   : > { %2232 = vst [vmem:[%s3432_s26 + $0x68] sm:$0xff] %v2523_v58  ;;  %v2524_v5 = vclamps-f32 %v1849_v2, 5.0  ;;  %v3769_v13 = vadd.f32 %v3460_v60, %v3278_v43  ;;  %v1785_v0 = vmul.f32 0.5, %v1657_v54  ;;  %v3775_v47 = vadd.f32 %v3462_v29, %v3280_v44 }
 0x153   : > { %2296 = vst [vmem:[%s3432_s26 + $0x268] sm:$0xff] %v2587_v41  ;;  %v1276_v52 = vadd.f32 %v1148_v55, %v3730_v6  ;;  %v3779_v18 = vadd.f32 %v3470_v22, %v3280_v44  ;;  %v1085_v37 = vmul.f32 0.044715, %v957_v25  ;;  %v3788_v59 = vadd.f32 %v3488_v39, %v3278_v43 }
 0x154   : > { %2233 = vst [vmem:[%s3432_s26 + $0x70] sm:$0xff] %v2524_v5  ;;  %v893_v60 = vmul.f32 %v3769_v13, %v3769_v13  ;;  %v3792_v48 = vadd.f32 %v3492_v4, %v3278_v43  ;;  %v1913_v29 = vmul.f32 %v1785_v0, %v3641_v1  ;;  %v830_v22 = vmul.f32 %v3775_v47, %v3775_v47 }
 0x155   : > { %v1404_v14 = vmul.f32 0.7978846, %v1276_v52  ;;  %v894_v34 = vmul.f32 %v3779_v18, %v3779_v18  ;;  %v2775_v49 = vpop.eup %2774  ;;  %v1213_v39 = vadd.f32 %v1085_v37, %v3745_v23  ;;  %v831_v4 = vmul.f32 %v3788_v59, %v3788_v59 }
 0x156   : > { %v1021_v12 = vmul.f32 %v893_v60, %v3769_v13  ;;  %v895_v1 = vmul.f32 %v3792_v48, %v3792_v48  ;;  %v2588_v38 = vclamps-f32 %v1913_v29, 5.0  ;;  %v1594_v19 = vadd.f32 1.0, %v2775_v49 }
 0x157   : > { %2784 = vtanh.f32 %v1404_v14  ;;  %v958_v24 = vmul.f32 %v830_v22, %v3775_v47  ;;  %v1341_v58 = vmul.f32 0.7978846, %v1213_v39  ;;  %v1022_v63 = vmul.f32 %v894_v34, %v3779_v18 }
 0x158   : > { %v1149_v2 = vmul.f32 0.044715, %v1021_v12  ;;  %v959_v41 = vmul.f32 %v831_v4, %v3788_v59  ;;  %v2777_v54 = vpop.eup %2776  ;;  %2297 = vst [vmem:[%s3432_s26 + $0x270] sm:$0xff] %v2588_v38  ;;  %v1722_v55 = vmul.f32 0.5, %v1594_v19  ;;  %v1023_v25 = vmul.f32 %v895_v1, %v3792_v48  ;;  %v3820_v19 = vpop.f32.mrb[44].mxu0 }
 0x159   : > { %v1086_v5 = vmul.f32 0.044715, %v958_v24  ;;  %v3814_v0 = vadd.f32 %v3494_v40, %v3280_v44  ;;  %v2779_v52 = vpop.eup %2778  ;;  %v1658_v37 = vadd.f32 1.0, %v2777_v54  ;;  %2786 = vtanh.f32 %v1341_v58 }
 0x15a   : > { %v1277_v60 = vadd.f32 %v1149_v2, %v3769_v13  ;;  %v1150_v29 = vmul.f32 0.044715, %v1022_v63  ;;  %v2781_v14 = vpop.eup %2780  ;;  %v1850_v22 = vmul.f32 %v1722_v55, %v3659_v11  ;;  %v1595_v34 = vadd.f32 1.0, %v2779_v52 }
 0x15b   : > { %v1214_v49 = vadd.f32 %v1086_v5, %v3775_v47  ;;  %v1087_v39 = vmul.f32 0.044715, %v959_v41  ;;  %v2783_v12 = vpop.eup %2782  ;;  %v1786_v4 = vmul.f32 0.5, %v1658_v37  ;;  %v1659_v1 = vadd.f32 1.0, %v2781_v14  ;;  %v3823_v5 = vpop.f32.mrb[44].mxu1 }
 0x15c   : > { %v1405_v38 = vmul.f32 0.7978846, %v1277_v60  ;;  %v1278_v40 = vadd.f32 %v1150_v29, %v3779_v18  ;;  %v2525_v24 = vclamps-f32 %v1850_v22, 5.0  ;;  %v1723_v58 = vmul.f32 0.5, %v1595_v34  ;;  %v3831_v22 = vpop.f32.mrb[45].mxu1 }
 0x15d   : > { %v1596_v2 = vadd.f32 1.0, %v2783_v12  ;;  %v1342_v63 = vmul.f32 0.7978846, %v1214_v49  ;;  %v1914_v54 = vmul.f32 %v1786_v4, %v3697_v15  ;;  %v1787_v11 = vmul.f32 0.5, %v1659_v1  ;;  %v3829_v15 = vpop.f32.mrb[45].mxu0 }
 0x15e   : > { %2788 = vtanh.f32 %v1405_v38  ;;  %v1406_v55 = vmul.f32 0.7978846, %v1278_v40  ;;  %2234 = vst [vmem:[%s3432_s26 + $0x78] sm:$0xff] %v2525_v24  ;;  %v1851_v41 = vmul.f32 %v1723_v58, %v3703_v20  ;;  %v1215_v37 = vadd.f32 %v1087_v39, %v3788_v59  ;;  %v3848_v24 = vpop.f32.mrb[46].mxu0 }
 0x15f   : > { %v1724_v52 = vmul.f32 0.5, %v1596_v2  ;;  %2790 = vtanh.f32 %v1342_v63  ;;  %v2589_v60 = vclamps-f32 %v1914_v54, 5.0  ;;  %v1915_v29 = vmul.f32 %v1787_v11, %v3707_v61 }
 0x160   : > { %2792 = vtanh.f32 %v1406_v55  ;;  %v1151_v14 = vmul.f32 0.044715, %v1023_v25  ;;  %v2526_v49 = vclamps-f32 %v1851_v41, 5.0  ;;  %v1343_v20 = vmul.f32 0.7978846, %v1215_v37 }
 0x161   : > { %v2785_v34 = vpop.eup %2784  ;;  %v1852_v12 = vmul.f32 %v1724_v52, %v3715_v62  ;;  %v832_v4 = vmul.f32 %v3814_v0, %v3814_v0  ;;  %2298 = vst [vmem:[%s3432_s26 + $0x278] sm:$0xff] %v2589_v60  ;;  %v2590_v39 = vclamps-f32 %v1915_v29, 5.0  ;;  %v3840_v25 = vadd.f32 %v3497_v21, %v3280_v44 }
 0x162   : > { %v1660_v1 = vadd.f32 1.0, %v2785_v34  ;;  %v1279_v61 = vadd.f32 %v1151_v14, %v3792_v48  ;;  %2235 = vst [vmem:[%s3432_s26 + $0x80] sm:$0xff] %v2526_v49  ;;  %2794 = vtanh.f32 %v1343_v20  ;;  %v3846_v62 = vadd.f32 %v3499_v57, %v3278_v43  ;;  %v3872_v49 = vpop.f32.mrb[46].mxu1 }
 0x163   : > { %v2527_v38 = vclamps-f32 %v1852_v12, 5.0  ;;  %v960_v40 = vmul.f32 %v832_v4, %v3814_v0  ;;  %v2787_v58 = vpop.eup %2786  ;;  %2299 = vst [vmem:[%s3432_s26 + $0x280] sm:$0xff] %v2590_v39  ;;  %v896_v54 = vmul.f32 %v3840_v25, %v3840_v25  ;;  %v3855_v21 = vadd.f32 %v3503_v28, %v3278_v43 }
 0x164   : > { %v1788_v2 = vmul.f32 0.5, %v1660_v1  ;;  %v1407_v63 = vmul.f32 0.7978846, %v1279_v61  ;;  %v1597_v11 = vadd.f32 1.0, %v2787_v58  ;;  %v833_v57 = vmul.f32 %v3846_v62, %v3846_v62 }
 0x165   : > { %2236 = vst [vmem:[%s3432_s26 + $0x88] sm:$0xff] %v2527_v38  ;;  %v1088_v55 = vmul.f32 0.044715, %v960_v40  ;;  %v3862_v41 = vadd.f32 %v3505_v30, %v3280_v44  ;;  %v1024_v37 = vmul.f32 %v896_v54, %v3840_v25  ;;  %v897_v60 = vmul.f32 %v3855_v21, %v3855_v21 }
 0x166   : > { %v1916_v52 = vmul.f32 %v1788_v2, %v3730_v6  ;;  %2796 = vtanh.f32 %v1407_v63  ;;  %v1725_v28 = vmul.f32 0.5, %v1597_v11  ;;  %v961_v14 = vmul.f32 %v833_v57, %v3846_v62 }
 0x167   : > { %v1216_v29 = vadd.f32 %v1088_v55, %v3814_v0  ;;  %v834_v34 = vmul.f32 %v3862_v41, %v3862_v41  ;;  %v1152_v6 = vmul.f32 0.044715, %v1024_v37  ;;  %v1025_v20 = vmul.f32 %v897_v60, %v3855_v21  ;;  %v3883_v55 = vpop.f32.mrb[47].mxu0 }
 0x168   : > { %v2789_v30 = vpop.eup %2788  ;;  %v2591_v12 = vclamps-f32 %v1916_v52, 5.0  ;;  %v3877_v4 = vadd.f32 %v3508_v31, %v3280_v44  ;;  %v1853_v1 = vmul.f32 %v1725_v28, %v3745_v23  ;;  %v1089_v40 = vmul.f32 0.044715, %v961_v14 }
 0x169   : > { %v2791_v39 = vpop.eup %2790  ;;  %v1661_v61 = vadd.f32 1.0, %v2789_v30  ;;  %v1344_v38 = vmul.f32 0.7978846, %v1216_v29  ;;  %v1280_v63 = vadd.f32 %v1152_v6, %v3840_v25  ;;  %v1153_v54 = vmul.f32 0.044715, %v1025_v20 }
 0x16a   : > { %v2793_v58 = vpop.eup %2792  ;;  %2300 = vst [vmem:[%s3432_s26 + $0x288] sm:$0xff] %v2591_v12  ;;  %v1598_v2 = vadd.f32 1.0, %v2791_v39  ;;  %v962_v11 = vmul.f32 %v834_v34, %v3862_v41  ;;  %v2528_v57 = vclamps-f32 %v1853_v1, 5.0  ;;  %v1217_v60 = vadd.f32 %v1089_v40, %v3846_v62  ;;  %v3892_v1 = vpop.f32.mrb[47].mxu1 }
 0x16b   : > { %v1789_v31 = vmul.f32 0.5, %v1661_v61  ;;  %v1662_v52 = vadd.f32 1.0, %v2793_v58  ;;  %2798 = vtanh.f32 %v1344_v38  ;;  %v1408_v23 = vmul.f32 0.7978846, %v1280_v63 }
 0x16c   : > { %v1726_v37 = vmul.f32 0.5, %v1598_v2  ;;  %v1281_v28 = vadd.f32 %v1153_v54, %v3855_v21  ;;  %v2795_v29 = vpop.eup %2794  ;;  %2237 = vst [vmem:[%s3432_s26 + $0x90] sm:$0xff] %v2528_v57  ;;  %v1090_v12 = vmul.f32 0.044715, %v962_v11  ;;  %v898_v34 = vmul.f32 %v3877_v4, %v3877_v4 }
 0x16d   : > { %v1917_v14 = vmul.f32 %v1789_v31, %v3769_v13  ;;  %v1790_v30 = vmul.f32 0.5, %v1662_v52  ;;  %v1599_v20 = vadd.f32 1.0, %v2795_v29  ;;  %2800 = vtanh.f32 %v1408_v23 }
 0x16e   : > { %v1854_v6 = vmul.f32 %v1726_v37, %v3775_v47  ;;  %v1345_v39 = vmul.f32 0.7978846, %v1217_v60  ;;  %v1409_v40 = vmul.f32 0.7978846, %v1281_v28  ;;  %v1218_v13 = vadd.f32 %v1090_v12, %v3862_v41 }
 0x16f   : > { %v2592_v61 = vclamps-f32 %v1917_v14, 5.0  ;;  %v1918_v38 = vmul.f32 %v1790_v30, %v3779_v18  ;;  %v1727_v63 = vmul.f32 0.5, %v1599_v20  ;;  %v1026_v54 = vmul.f32 %v898_v34, %v3877_v4  ;;  %v3922_v14 = vpop.f32.mrb[48].mxu0  ;;  %v3924_v30 = vpop.f32.mrb[48].mxu1 }
 0x170   : > { %v2797_v58 = vpop.eup %2796  ;;  %v2529_v2 = vclamps-f32 %v1854_v6, 5.0  ;;  %2802 = vtanh.f32 %v1345_v39  ;;  %v1346_v57 = vmul.f32 0.7978846, %v1218_v13  ;;  %v3902_v18 = vadd.f32 %v3531_v8, %v3278_v43  ;;  %v3935_v20 = vpop.f32.mrb[49].mxu0 }
 0x171   : > { %2301 = vst [vmem:[%s3432_s26 + $0x290] sm:$0xff] %v2592_v61  ;;  %v2593_v47 = vclamps-f32 %v1918_v38, 5.0  ;;  %v1663_v11 = vadd.f32 1.0, %v2797_v58  ;;  %2804 = vtanh.f32 %v1409_v40  ;;  %v1855_v31 = vmul.f32 %v1727_v63, %v3788_v59  ;;  %v3940_v40 = vpop.f32.mrb[49].mxu1 }
 0x172   : > { %2238 = vst [vmem:[%s3432_s26 + $0x98] sm:$0xff] %v2529_v2  ;;  %v1154_v52 = vmul.f32 0.044715, %v1026_v54  ;;  %v3906_v37 = vadd.f32 %v3540_v17, %v3278_v43  ;;  %2806 = vtanh.f32 %v1346_v57  ;;  %v3911_v60 = vadd.f32 %v3542_v46, %v3280_v44 }
 0x173   : > { %2302 = vst [vmem:[%s3432_s26 + $0x298] sm:$0xff] %v2593_v47  ;;  %v1791_v23 = vmul.f32 0.5, %v1663_v11  ;;  %v3915_v59 = vadd.f32 %v3548_v26, %v3280_v44  ;;  %v2530_v28 = vclamps-f32 %v1855_v31, 5.0  ;;  %v835_v29 = vmul.f32 %v3902_v18, %v3902_v18 }
 0x174   : > { %v1282_v8 = vadd.f32 %v1154_v52, %v3877_v4  ;;  %v899_v17 = vmul.f32 %v3906_v37, %v3906_v37  ;;  %v836_v26 = vmul.f32 %v3911_v60, %v3911_v60  ;;  %v3933_v6 = vadd.f32 %v3550_v50, %v3278_v43 }
 0x175   : > { %v2799_v12 = vpop.eup %2798  ;;  %v1919_v46 = vmul.f32 %v1791_v23, %v3792_v48  ;;  %v900_v34 = vmul.f32 %v3915_v59, %v3915_v59  ;;  %2239 = vst [vmem:[%s3432_s26 + $0xa0] sm:$0xff] %v2530_v28  ;;  %v963_v38 = vmul.f32 %v835_v29, %v3902_v18 }
 0x176   : > { %v1600_v39 = vadd.f32 1.0, %v2799_v12  ;;  %v1410_v61 = vmul.f32 0.7978846, %v1282_v8  ;;  %v1027_v48 = vmul.f32 %v899_v17, %v3906_v37  ;;  %v964_v58 = vmul.f32 %v836_v26, %v3911_v60 }
 0x177   : > { %v2594_v13 = vclamps-f32 %v1919_v46, 5.0  ;;  %v1028_v2 = vmul.f32 %v900_v34, %v3915_v59  ;;  %v837_v50 = vmul.f32 %v3933_v6, %v3933_v6  ;;  %v2801_v63 = vpop.eup %2800  ;;  %v1091_v47 = vmul.f32 0.044715, %v963_v38 }
 0x178   : > { %v1728_v54 = vmul.f32 0.5, %v1600_v39  ;;  %2808 = vtanh.f32 %v1410_v61  ;;  %v1155_v11 = vmul.f32 0.044715, %v1027_v48  ;;  %v1664_v57 = vadd.f32 1.0, %v2801_v63 }
 0x179   : > { %2303 = vst [vmem:[%s3432_s26 + $0x2a0] sm:$0xff] %v2594_v13  ;;  %v1092_v31 = vmul.f32 0.044715, %v964_v58  ;;  %v1156_v52 = vmul.f32 0.044715, %v1028_v2  ;;  %v965_v23 = vmul.f32 %v837_v50, %v3933_v6  ;;  %v1219_v29 = vadd.f32 %v1091_v47, %v3902_v18 }
 0x17a   : > { %v2803_v28 = vpop.eup %2802  ;;  %v1856_v8 = vmul.f32 %v1728_v54, %v3814_v0  ;;  %v1283_v17 = vadd.f32 %v1155_v11, %v3906_v37  ;;  %v3953_v12 = vadd.f32 %v3560_v32, %v3278_v43  ;;  %v1792_v26 = vmul.f32 0.5, %v1664_v57  ;;  %v3959_v57 = vpop.f32.mrb[50].mxu0 }
 0x17b   : > { %v2805_v46 = vpop.eup %2804  ;;  %v1601_v34 = vadd.f32 1.0, %v2803_v28  ;;  %v1220_v39 = vadd.f32 %v1092_v31, %v3911_v60  ;;  %v1284_v61 = vadd.f32 %v1156_v52, %v3915_v59  ;;  %v1347_v13 = vmul.f32 0.7978846, %v1219_v29  ;;  %v3961_v31 = vpop.f32.mrb[50].mxu1 }
 0x17c   : > { %v2531_v38 = vclamps-f32 %v1856_v8, 5.0  ;;  %v1665_v48 = vadd.f32 1.0, %v2805_v46  ;;  %v1411_v0 = vmul.f32 0.7978846, %v1283_v17  ;;  %v2807_v58 = vpop.eup %2806  ;;  %v1920_v2 = vmul.f32 %v1792_v26, %v3840_v25  ;;  %v3968_v46 = vpop.f32.mrb[51].mxu0 }
 0x17d   : > { %v1729_v50 = vmul.f32 0.5, %v1601_v34  ;;  %v1348_v63 = vmul.f32 0.7978846, %v1220_v39  ;;  %v1412_v54 = vmul.f32 0.7978846, %v1284_v61  ;;  %v1602_v47 = vadd.f32 1.0, %v2807_v58 }
 0x17e   : > { %2240 = vst [vmem:[%s3432_s26 + $0xa8] sm:$0xff] %v2531_v38  ;;  %v1793_v32 = vmul.f32 0.5, %v1665_v48  ;;  %2810 = vtanh.f32 %v1347_v13  ;;  %v1093_v11 = vmul.f32 0.044715, %v965_v23  ;;  %v2595_v52 = vclamps-f32 %v1920_v2, 5.0  ;;  %4864 = vst [vmem:[#allocation25_spill] sm:$0xff] %v3968_v46 }
 0x17f   : > { %v1857_v28 = vmul.f32 %v1729_v50, %v3846_v62  ;;  %2812 = vtanh.f32 %v1411_v0  ;;  %v901_v25 = vmul.f32 %v3953_v12, %v3953_v12  ;;  %v1730_v29 = vmul.f32 0.5, %v1602_v47  ;;  %v3970_v23 = vpop.f32.mrb[51].mxu1  ;;  %v4866_v48 = vld [vmem:[#allocation5_spill] sm:$0xff]  ;;  %v4867_v50 = vld [vmem:[#allocation6_spill] sm:$0xff] }
 0x180   : > { %v1921_v8 = vmul.f32 %v1793_v32, %v3855_v21  ;;  %2814 = vtanh.f32 %v1348_v63  ;;  %v1221_v17 = vadd.f32 %v1093_v11, %v3933_v6  ;;  %4865 = vst [vmem:[#allocation26_spill] sm:$0xff] %v3970_v23  ;;  %2304 = vst [vmem:[%s3432_s26 + $0x2a8] sm:$0xff] %v2595_v52  ;;  %v3976_v34 = vadd.f32 %v3562_v51, %v3280_v44 }
 0x181   : > { %v2532_v26 = vclamps-f32 %v1857_v28, 5.0  ;;  %2816 = vtanh.f32 %v1412_v54  ;;  %v1029_v62 = vmul.f32 %v901_v25, %v3953_v12  ;;  %v1858_v61 = vmul.f32 %v1730_v29, %v3862_v41 }
 0x182   : > { %v2809_v21 = vpop.eup %2808  ;;  %v2596_v39 = vclamps-f32 %v1921_v8, 5.0  ;;  %v1349_v38 = vmul.f32 0.7978846, %v1221_v17  ;;  %v3981_v13 = vadd.f32 %v4866_v48, %v3280_v44  ;;  %v838_v2 = vmul.f32 %v3976_v34, %v3976_v34 }
 0x183   : > { %2241 = vst [vmem:[%s3432_s26 + $0xb0] sm:$0xff] %v2532_v26  ;;  %v1666_v0 = vadd.f32 1.0, %v2809_v21  ;;  %v1157_v58 = vmul.f32 0.044715, %v1029_v62  ;;  %v3988_v51 = vadd.f32 %v4867_v50, %v3278_v43  ;;  %v2533_v63 = vclamps-f32 %v1858_v61, 5.0 }
 0x184   : > { %2305 = vst [vmem:[%s3432_s26 + $0x2b0] sm:$0xff] %v2596_v39  ;;  %2818 = vtanh.f32 %v1349_v38  ;;  %v902_v41 = vmul.f32 %v3981_v13, %v3981_v13  ;;  %v3995_v54 = vadd.f32 %v3586_v36, %v3278_v43  ;;  %v966_v11 = vmul.f32 %v838_v2, %v3976_v34  ;;  %v4868_v36 = vld [vmem:[#allocation7_spill] sm:$0xff]  ;;  %v4015_v39 = vpop.f32.mrb[52].mxu0 }
 0x185   : > { %v1794_v32 = vmul.f32 0.5, %v1666_v0  ;;  %v1285_v47 = vadd.f32 %v1157_v58, %v3953_v12  ;;  %v839_v52 = vmul.f32 %v3988_v51, %v3988_v51  ;;  %2242 = vst [vmem:[%s3432_s26 + $0xb8] sm:$0xff] %v2533_v63  ;;  %v4007_v8 = vadd.f32 %v3588_v42, %v3280_v44  ;;  %4869 = vst [vmem:[#allocation5_spill] sm:$0xff] %v4015_v39 }
 0x186   : > { %v1030_v28 = vmul.f32 %v902_v41, %v3981_v13  ;;  %v903_v25 = vmul.f32 %v3995_v54, %v3995_v54  ;;  %v4011_v29 = vadd.f32 %v4868_v36, %v3280_v44  ;;  %v1094_v62 = vmul.f32 0.044715, %v966_v11 }
 0x187   : > { %v1922_v17 = vmul.f32 %v1794_v32, %v3877_v4  ;;  %v1413_v26 = vmul.f32 0.7978846, %v1285_v47  ;;  %v967_v21 = vmul.f32 %v839_v52, %v3988_v51  ;;  %v840_v42 = vmul.f32 %v4007_v8, %v4007_v8  ;;  %v4024_v52 = vpop.f32.mrb[52].mxu1 }
 0x188   : > { %v2811_v61 = vpop.eup %2810  ;;  %v1158_v38 = vmul.f32 0.044715, %v1030_v28  ;;  %v1031_v48 = vmul.f32 %v903_v25, %v3995_v54  ;;  %v904_v0 = vmul.f32 %v4011_v29, %v4011_v29  ;;  %v1222_v50 = vadd.f32 %v1094_v62, %v3976_v34 }
 0x189   : > { %v2813_v58 = vpop.eup %2812  ;;  %v2597_v2 = vclamps-f32 %v1922_v17, 5.0  ;;  %v1603_v4 = vadd.f32 1.0, %v2811_v61  ;;  %2820 = vtanh.f32 %v1413_v26  ;;  %v1095_v47 = vmul.f32 0.044715, %v967_v21 }
 0x18a   : > { %v2815_v63 = vpop.eup %2814  ;;  %v1667_v41 = vadd.f32 1.0, %v2813_v58  ;;  %v1286_v32 = vadd.f32 %v1158_v38, %v3981_v13  ;;  %v1159_v11 = vmul.f32 0.044715, %v1031_v48  ;;  %v1350_v39 = vmul.f32 0.7978846, %v1222_v50  ;;  %v4032_v50 = vpop.f32.mrb[53].mxu0 }
 0x18b   : > { %v2817_v28 = vpop.eup %2816  ;;  %2306 = vst [vmem:[%s3432_s26 + $0x2b8] sm:$0xff] %v2597_v2  ;;  %v1731_v25 = vmul.f32 0.5, %v1603_v4  ;;  %v1604_v36 = vadd.f32 1.0, %v2815_v63  ;;  %v968_v23 = vmul.f32 %v840_v42, %v4007_v8  ;;  %v1223_v62 = vadd.f32 %v1095_v47, %v3988_v51  ;;  %v4034_v42 = vpop.f32.mrb[53].mxu1 }
 0x18c   : > { %v1795_v17 = vmul.f32 0.5, %v1667_v41  ;;  %v1668_v61 = vadd.f32 1.0, %v2817_v28  ;;  %v1414_v26 = vmul.f32 0.7978846, %v1286_v32  ;;  %2822 = vtanh.f32 %v1350_v39  ;;  %4870 = vst [vmem:[#allocation6_spill] sm:$0xff] %v4034_v42 }
 0x18d   : > { %v1859_v58 = vmul.f32 %v1731_v25, %v3902_v18  ;;  %v1732_v46 = vmul.f32 0.5, %v1604_v36  ;;  %v1287_v21 = vadd.f32 %v1159_v11, %v3995_v54  ;;  %v1351_v4 = vmul.f32 0.7978846, %v1223_v62  ;;  %v4040_v36 = vpop.f32.mrb[54].mxu0 }
 0x18e   : > { %v2819_v38 = vpop.eup %2818  ;;  %v1923_v48 = vmul.f32 %v1795_v17, %v3906_v37  ;;  %v1796_v2 = vmul.f32 0.5, %v1668_v61  ;;  %2824 = vtanh.f32 %v1414_v26  ;;  %v1096_v11 = vmul.f32 0.044715, %v968_v23  ;;  %4871 = vst [vmem:[#allocation7_spill] sm:$0xff] %v4040_v36  ;;  %v4042_v17 = vpop.f32.mrb[54].mxu1  ;;  %v4874_v23 = vld [vmem:[#allocation9_spill] sm:$0xff] }
 0x18f   : > { %v2534_v63 = vclamps-f32 %v1859_v58, 5.0  ;;  %v1860_v41 = vmul.f32 %v1732_v46, %v3911_v60  ;;  %v1605_v18 = vadd.f32 1.0, %v2819_v38  ;;  %v1415_v32 = vmul.f32 0.7978846, %v1287_v21  ;;  %4872 = vst [vmem:[#allocation27_spill] sm:$0xff] %v4042_v17  ;;  %v4875_v21 = vld [vmem:[#allocation10_spill] sm:$0xff] }
 0x190   : > { %v2598_v39 = vclamps-f32 %v1923_v48, 5.0  ;;  %v1924_v47 = vmul.f32 %v1796_v2, %v3915_v59  ;;  %2826 = vtanh.f32 %v1351_v4  ;;  %v1032_v25 = vmul.f32 %v904_v0, %v4011_v29  ;;  %v4873_v59 = vld [vmem:[#allocation8_spill] sm:$0xff]  ;;  %v4876_v48 = vld [vmem:[#allocation11_spill] sm:$0xff] }
 0x191   : > { %2243 = vst [vmem:[%s3432_s26 + $0xc0] sm:$0xff] %v2534_v63  ;;  %v2535_v37 = vclamps-f32 %v1860_v41, 5.0  ;;  %v1733_v28 = vmul.f32 0.5, %v1605_v18  ;;  %2828 = vtanh.f32 %v1415_v32  ;;  %v1224_v46 = vadd.f32 %v1096_v11, %v4007_v8 }
 0x192   : > { %2307 = vst [vmem:[%s3432_s26 + $0x2c0] sm:$0xff] %v2598_v39  ;;  %v2599_v60 = vclamps-f32 %v1924_v47, 5.0  ;;  %v4048_v61 = vadd.f32 %v4873_v59, %v3278_v43  ;;  %v4052_v26 = vadd.f32 %v4874_v23, %v3278_v43  ;;  %v1160_v58 = vmul.f32 0.044715, %v1032_v25  ;;  %v4877_v23 = vld [vmem:[#allocation12_spill] sm:$0xff] }
 0x193   : > { %v2821_v62 = vpop.eup %2820  ;;  %2244 = vst [vmem:[%s3432_s26 + $0xc8] sm:$0xff] %v2535_v37  ;;  %v1861_v0 = vmul.f32 %v1733_v28, %v3933_v6  ;;  %v4058_v38 = vadd.f32 %v4875_v21, %v3280_v44  ;;  %v4062_v2 = vadd.f32 %v4876_v48, %v3280_v44  ;;  %v1352_v63 = vmul.f32 0.7978846, %v1224_v46 }
 0x194   : > { %2308 = vst [vmem:[%s3432_s26 + $0x2c8] sm:$0xff] %v2599_v60  ;;  %v1669_v4 = vadd.f32 1.0, %v2821_v62  ;;  %v841_v41 = vmul.f32 %v4048_v61, %v4048_v61  ;;  %v905_v18 = vmul.f32 %v4052_v26, %v4052_v26  ;;  %v1288_v32 = vadd.f32 %v1160_v58, %v4011_v29 }
 0x195   : > { %v2536_v6 = vclamps-f32 %v1861_v0, 5.0  ;;  %v842_v39 = vmul.f32 %v4058_v38, %v4058_v38  ;;  %v906_v47 = vmul.f32 %v4062_v2, %v4062_v2  ;;  %2830 = vtanh.f32 %v1352_v63  ;;  %v4083_v0 = vpop.f32.mrb[55].mxu0 }
 0x196   : > { %v1797_v11 = vmul.f32 0.5, %v1669_v4  ;;  %v969_v37 = vmul.f32 %v841_v41, %v4048_v61  ;;  %v1033_v28 = vmul.f32 %v905_v18, %v4052_v26  ;;  %v2823_v25 = vpop.eup %2822  ;;  %v1416_v60 = vmul.f32 0.7978846, %v1288_v32  ;;  %4878 = vst [vmem:[#allocation8_spill] sm:$0xff] %v4083_v0  ;;  %v4086_v41 = vpop.f32.mrb[55].mxu1 }
 0x197   : > { %2245 = vst [vmem:[%s3432_s26 + $0xd0] sm:$0xff] %v2536_v6  ;;  %v970_v46 = vmul.f32 %v842_v39, %v4058_v38  ;;  %v1034_v59 = vmul.f32 %v906_v47, %v4062_v2  ;;  %v4081_v62 = vadd.f32 %v4877_v23, %v3278_v43  ;;  %v1606_v48 = vadd.f32 1.0, %v2823_v25 }
 0x198   : > { %v2825_v58 = vpop.eup %2824  ;;  %v1925_v21 = vmul.f32 %v1797_v11, %v3953_v12  ;;  %v1097_v4 = vmul.f32 0.044715, %v969_v37  ;;  %v1161_v63 = vmul.f32 0.044715, %v1033_v28  ;;  %2832 = vtanh.f32 %v1416_v60 }
 0x199   : > { %v1670_v18 = vadd.f32 1.0, %v2825_v58  ;;  %v1098_v6 = vmul.f32 0.044715, %v970_v46  ;;  %v1162_v32 = vmul.f32 0.044715, %v1034_v59  ;;  %v1734_v17 = vmul.f32 0.5, %v1606_v48 }
 0x19a   : > { %v2827_v39 = vpop.eup %2826  ;;  %v2600_v47 = vclamps-f32 %v1925_v21, 5.0  ;;  %v1225_v23 = vadd.f32 %v1097_v4, %v4048_v61  ;;  %v1289_v0 = vadd.f32 %v1161_v63, %v4052_v26 }
 0x19b   : > { %v2829_v36 = vpop.eup %2828  ;;  %v1798_v42 = vmul.f32 0.5, %v1670_v18  ;;  %v1607_v12 = vadd.f32 1.0, %v2827_v39  ;;  %v1226_v11 = vadd.f32 %v1098_v6, %v4058_v38  ;;  %v1290_v37 = vadd.f32 %v1162_v32, %v4062_v2 }
 0x19c   : > { %2309 = vst [vmem:[%s3432_s26 + $0x2d0] sm:$0xff] %v2600_v47  ;;  %v1862_v28 = vmul.f32 %v1734_v17, %v3976_v34  ;;  %v1671_v25 = vadd.f32 1.0, %v2829_v36  ;;  %v1353_v60 = vmul.f32 0.7978846, %v1225_v23  ;;  %v1417_v46 = vmul.f32 0.7978846, %v1289_v0 }
 0x19d   : > { %v1926_v59 = vmul.f32 %v1798_v42, %v3981_v13  ;;  %v1735_v58 = vmul.f32 0.5, %v1607_v12  ;;  %v1354_v21 = vmul.f32 0.7978846, %v1226_v11  ;;  %v1418_v48 = vmul.f32 0.7978846, %v1290_v37  ;;  %v4879_v34 = vld [vmem:[#allocation13_spill] sm:$0xff] }
 0x19e   : > { %v2537_v4 = vclamps-f32 %v1862_v28, 5.0  ;;  %v1799_v63 = vmul.f32 0.5, %v1671_v25  ;;  %2834 = vtanh.f32 %v1353_v60  ;;  %v843_v18 = vmul.f32 %v4081_v62, %v4081_v62  ;;  %v4880_v0 = vld [vmem:[#allocation14_spill] sm:$0xff]  ;;  %v4881_v37 = vld [vmem:[#allocation15_spill] sm:$0xff]  ;;  %v4118_v25 = vpop.f32.mrb[56].mxu0  ;;  %v4120_v60 = vpop.f32.mrb[56].mxu1 }
 0x19f   : > { %v2601_v6 = vclamps-f32 %v1926_v59, 5.0  ;;  %v1863_v32 = vmul.f32 %v1735_v58, %v3988_v51  ;;  %2836 = vtanh.f32 %v1417_v46  ;;  %v4100_v36 = vadd.f32 %v4879_v34, %v3278_v43  ;;  %v2831_v17 = vpop.eup %2830  ;;  %4882 = vst [vmem:[#allocation9_spill] sm:$0xff] %v4120_v60 }
 0x1a0   : > { %2246 = vst [vmem:[%s3432_s26 + $0xd8] sm:$0xff] %v2537_v4  ;;  %v1927_v13 = vmul.f32 %v1799_v63, %v3995_v54  ;;  %2838 = vtanh.f32 %v1354_v21  ;;  %v971_v42 = vmul.f32 %v843_v18, %v4081_v62  ;;  %v4107_v39 = vadd.f32 %v4880_v0, %v3280_v44  ;;  %v4883_v21 = vld [vmem:[#allocation16_spill] sm:$0xff]  ;;  %v4884_v4 = vld [vmem:[#allocation17_spill] sm:$0xff]  ;;  %v4132_v18 = vpop.f32.mrb[57].mxu0 }
 0x1a1   : > { %2310 = vst [vmem:[%s3432_s26 + $0x2d8] sm:$0xff] %v2601_v6  ;;  %v2538_v47 = vclamps-f32 %v1863_v32, 5.0  ;;  %v1608_v51 = vadd.f32 1.0, %v2831_v17  ;;  %2840 = vtanh.f32 %v1418_v48  ;;  %v907_v23 = vmul.f32 %v4100_v36, %v4100_v36  ;;  %4885 = vst [vmem:[#allocation10_spill] sm:$0xff] %v4132_v18  ;;  %v4134_v6 = vpop.f32.mrb[57].mxu1 }
 0x1a2   : > { %v2602_v12 = vclamps-f32 %v1927_v13, 5.0  ;;  %v1099_v11 = vmul.f32 0.044715, %v971_v42  ;;  %v844_v54 = vmul.f32 %v4107_v39, %v4107_v39  ;;  %v4116_v28 = vadd.f32 %v4881_v37, %v3280_v44  ;;  %v2833_v46 = vpop.eup %2832  ;;  %4886 = vst [vmem:[#allocation11_spill] sm:$0xff] %v4134_v6  ;;  %v4141_v42 = vpop.f32.mrb[58].mxu0 }
 0x1a3   : > { %2247 = vst [vmem:[%s3432_s26 + $0xe0] sm:$0xff] %v2538_v47  ;;  %v1736_v59 = vmul.f32 0.5, %v1608_v51  ;;  %v1035_v58 = vmul.f32 %v907_v23, %v4100_v36  ;;  %v4126_v48 = vadd.f32 %v4883_v21, %v3278_v43  ;;  %v4130_v63 = vadd.f32 %v4884_v4, %v3278_v43  ;;  %4887 = vst [vmem:[#allocation12_spill] sm:$0xff] %v4141_v42 }
 0x1a4   : > { %2311 = vst [vmem:[%s3432_s26 + $0x2e0] sm:$0xff] %v2602_v12  ;;  %v1672_v32 = vadd.f32 1.0, %v2833_v46  ;;  %v1227_v34 = vadd.f32 %v1099_v11, %v4081_v62  ;;  %v972_v17 = vmul.f32 %v844_v54, %v4107_v39  ;;  %v908_v13 = vmul.f32 %v4116_v28, %v4116_v28 }
 0x1a5   : > { %v1864_v0 = vmul.f32 %v1736_v59, %v4007_v8  ;;  %v1163_v47 = vmul.f32 0.044715, %v1035_v58  ;;  %v845_v51 = vmul.f32 %v4126_v48, %v4126_v48  ;;  %v909_v23 = vmul.f32 %v4130_v63, %v4130_v63 }
 0x1a6   : > { %v1800_v12 = vmul.f32 0.5, %v1672_v32  ;;  %v1355_v37 = vmul.f32 0.7978846, %v1227_v34  ;;  %v1100_v11 = vmul.f32 0.044715, %v972_v17  ;;  %v1036_v54 = vmul.f32 %v908_v13, %v4116_v28  ;;  %v4888_v13 = vld [vmem:[#allocation18_spill] sm:$0xff] }
 0x1a7   : > { %v2539_v46 = vclamps-f32 %v1864_v0, 5.0  ;;  %v1291_v21 = vadd.f32 %v1163_v47, %v4100_v36  ;;  %v973_v4 = vmul.f32 %v845_v51, %v4126_v48  ;;  %v1037_v8 = vmul.f32 %v909_v23, %v4130_v63 }
 0x1a8   : > { %v2835_v59 = vpop.eup %2834  ;;  %v1928_v58 = vmul.f32 %v1800_v12, %v4011_v29  ;;  %2842 = vtanh.f32 %v1355_v37  ;;  %v1228_v42 = vadd.f32 %v1100_v11, %v4107_v39  ;;  %v1164_v6 = vmul.f32 0.044715, %v1036_v54 }
 0x1a9   : > { %v2837_v18 = vpop.eup %2836  ;;  %2248 = vst [vmem:[%s3432_s26 + $0xe8] sm:$0xff] %v2539_v46  ;;  %v1609_v32 = vadd.f32 1.0, %v2835_v59  ;;  %v1419_v34 = vmul.f32 0.7978846, %v1291_v21  ;;  %v1101_v17 = vmul.f32 0.044715, %v973_v4  ;;  %v4157_v0 = vadd.f32 %v4888_v13, %v3280_v44 }
 0x1aa   : > { %v2839_v47 = vpop.eup %2838  ;;  %v2603_v51 = vclamps-f32 %v1928_v58, 5.0  ;;  %v1673_v23 = vadd.f32 1.0, %v2837_v18  ;;  %v1356_v60 = vmul.f32 0.7978846, %v1228_v42  ;;  %v1292_v29 = vadd.f32 %v1164_v6, %v4116_v28  ;;  %v4162_v59 = vpop.f32.mrb[58].mxu1 }
 0x1ab   : > { %v2841_v12 = vpop.eup %2840  ;;  %v1737_v37 = vmul.f32 0.5, %v1609_v32  ;;  %v1610_v11 = vadd.f32 1.0, %v2839_v47  ;;  %2844 = vtanh.f32 %v1419_v34  ;;  %v1229_v54 = vadd.f32 %v1101_v17, %v4126_v48  ;;  %v4168_v17 = vpop.f32.mrb[59].mxu0 }
 0x1ac   : > { %2312 = vst [vmem:[%s3432_s26 + $0x2e8] sm:$0xff] %v2603_v51  ;;  %v1801_v46 = vmul.f32 0.5, %v1673_v23  ;;  %v1674_v21 = vadd.f32 1.0, %v2841_v12  ;;  %2846 = vtanh.f32 %v1356_v60  ;;  %v1420_v4 = vmul.f32 0.7978846, %v1292_v29  ;;  %v4170_v60 = vpop.f32.mrb[59].mxu1 }
 0x1ad   : > { %v1865_v13 = vmul.f32 %v1737_v37, %v4048_v61  ;;  %v1738_v58 = vmul.f32 0.5, %v1610_v11  ;;  %v1357_v18 = vmul.f32 0.7978846, %v1229_v54  ;;  %v1165_v42 = vmul.f32 0.044715, %v1037_v8  ;;  %4889 = vst [vmem:[#allocation13_spill] sm:$0xff] %v4170_v60 }
 0x1ae   : > { %v1929_v6 = vmul.f32 %v1801_v46, %v4052_v26  ;;  %v1802_v32 = vmul.f32 0.5, %v1674_v21  ;;  %2848 = vtanh.f32 %v1420_v4  ;;  %v846_v34 = vmul.f32 %v4157_v0, %v4157_v0  ;;  %v4890_v29 = vld [vmem:[#allocation19_spill] sm:$0xff] }
 0x1af   : > { %v2540_v47 = vclamps-f32 %v1865_v13, 5.0  ;;  %v1866_v51 = vmul.f32 %v1738_v58, %v4058_v38  ;;  %2850 = vtanh.f32 %v1357_v18  ;;  %v1293_v61 = vadd.f32 %v1165_v42, %v4130_v63 }
 0x1b0   : > { %v2604_v8 = vclamps-f32 %v1929_v6, 5.0  ;;  %v1930_v26 = vmul.f32 %v1802_v32, %v4062_v2  ;;  %v974_v23 = vmul.f32 %v846_v34, %v4157_v0  ;;  %v4178_v12 = vadd.f32 %v4890_v29, %v3280_v44  ;;  %v4210_v32 = vpop.f32.mrb[60].mxu0  ;;  %v4212_v34 = vpop.f32.mrb[60].mxu1 }
 0x1b1   : > { %2249 = vst [vmem:[%s3432_s26 + $0xf0] sm:$0xff] %v2540_v47  ;;  %v2541_v37 = vclamps-f32 %v1866_v51, 5.0  ;;  %v1421_v11 = vmul.f32 0.7978846, %v1293_v61  ;;  %v4183_v38 = vadd.f32 %v3670_v33, %v3278_v43  ;;  %v4187_v54 = vadd.f32 %v3673_v10, %v3278_v43  ;;  %4891 = vst [vmem:[#allocation14_spill] sm:$0xff] %v4210_v32 }
 0x1b2   : > { %v2843_v46 = vpop.eup %2842  ;;  %2313 = vst [vmem:[%s3432_s26 + $0x2f0] sm:$0xff] %v2604_v8  ;;  %v2605_v2 = vclamps-f32 %v1930_v26, 5.0  ;;  %v1102_v21 = vmul.f32 0.044715, %v974_v23  ;;  %v910_v4 = vmul.f32 %v4178_v12, %v4178_v12  ;;  %v4194_v13 = vadd.f32 %v3675_v45, %v3280_v44  ;;  %4892 = vst [vmem:[#allocation15_spill] sm:$0xff] %v4212_v34 }
 0x1b3   : > { %2250 = vst [vmem:[%s3432_s26 + $0xf8] sm:$0xff] %v2541_v37  ;;  %v1611_v58 = vadd.f32 1.0, %v2843_v46  ;;  %2852 = vtanh.f32 %v1421_v11  ;;  %v847_v33 = vmul.f32 %v4183_v38, %v4183_v38  ;;  %v911_v10 = vmul.f32 %v4187_v54, %v4187_v54 }
 0x1b4   : > { %2314 = vst [vmem:[%s3432_s26 + $0x2f8] sm:$0xff] %v2605_v2  ;;  %v1230_v18 = vadd.f32 %v1102_v21, %v4157_v0  ;;  %v1038_v42 = vmul.f32 %v910_v4, %v4178_v12  ;;  %v848_v6 = vmul.f32 %v4194_v13, %v4194_v13  ;;  %v4208_v45 = vadd.f32 %v3678_v27, %v3280_v44 }
 0x1b5   : > { %v2845_v47 = vpop.eup %2844  ;;  %v1739_v51 = vmul.f32 0.5, %v1611_v58  ;;  %v975_v61 = vmul.f32 %v847_v33, %v4183_v38  ;;  %v1039_v8 = vmul.f32 %v911_v10, %v4187_v54  ;;  %v4218_v26 = vadd.f32 %v3681_v35, %v3278_v43 }
 0x1b6   : > { %v2847_v23 = vpop.eup %2846  ;;  %v1675_v29 = vadd.f32 1.0, %v2845_v47  ;;  %v1358_v37 = vmul.f32 0.7978846, %v1230_v18  ;;  %v1166_v11 = vmul.f32 0.044715, %v1038_v42  ;;  %v976_v27 = vmul.f32 %v848_v6, %v4194_v13  ;;  %v4224_v42 = vpop.f32.mrb[61].mxu0 }
 0x1b7   : > { %v1867_v46 = vmul.f32 %v1739_v51, %v4081_v62  ;;  %v1612_v2 = vadd.f32 1.0, %v2847_v23  ;;  %v1103_v21 = vmul.f32 0.044715, %v975_v61  ;;  %v1167_v4 = vmul.f32 0.044715, %v1039_v8  ;;  %4893 = vst [vmem:[#allocation16_spill] sm:$0xff] %v4224_v42 }
 0x1b8   : > { %v2849_v58 = vpop.eup %2848  ;;  %v1803_v33 = vmul.f32 0.5, %v1675_v29  ;;  %2854 = vtanh.f32 %v1358_v37  ;;  %v1294_v10 = vadd.f32 %v1166_v11, %v4178_v12  ;;  %v1104_v34 = vmul.f32 0.044715, %v976_v27 }
 0x1b9   : > { %v2851_v35 = vpop.eup %2850  ;;  %v2542_v32 = vclamps-f32 %v1867_v46, 5.0  ;;  %v1740_v60 = vmul.f32 0.5, %v1612_v2  ;;  %v1676_v47 = vadd.f32 1.0, %v2849_v58  ;;  %v1231_v18 = vadd.f32 %v1103_v21, %v4183_v38  ;;  %v4231_v2 = vpop.f32.mrb[61].mxu1 }
 0x1ba   : > { %v1931_v62 = vmul.f32 %v1803_v33, %v4100_v36  ;;  %v1613_v6 = vadd.f32 1.0, %v2851_v35  ;;  %v1422_v51 = vmul.f32 0.7978846, %v1294_v10  ;;  %v1295_v61 = vadd.f32 %v1167_v4, %v4187_v54  ;;  %4894 = vst [vmem:[#allocation17_spill] sm:$0xff] %v4231_v2  ;;  %v4240_v33 = vpop.f32.mrb[62].mxu1 }
 0x1bb   : > { %2251 = vst [vmem:[%s3432_s26 + $0x100] sm:$0xff] %v2542_v32  ;;  %v1868_v8 = vmul.f32 %v1740_v60, %v4107_v39  ;;  %v1804_v23 = vmul.f32 0.5, %v1676_v47  ;;  %v1359_v29 = vmul.f32 0.7978846, %v1231_v18  ;;  %v1232_v37 = vadd.f32 %v1104_v34, %v4194_v13  ;;  %v4238_v34 = vpop.f32.mrb[62].mxu0  ;;  %4896 = vst [vmem:[#allocation19_spill] sm:$0xff] %v4240_v33 }
 0x1bc   : > { %v2606_v11 = vclamps-f32 %v1931_v62, 5.0  ;;  %v1741_v27 = vmul.f32 0.5, %v1613_v6  ;;  %2856 = vtanh.f32 %v1422_v51  ;;  %v1423_v46 = vmul.f32 0.7978846, %v1295_v61  ;;  %4895 = vst [vmem:[#allocation18_spill] sm:$0xff] %v4238_v34  ;;  %v4897_v62 = vld [vmem:[#allocation20_spill] sm:$0xff] }
 0x1bd   : > { %v2853_v36 = vpop.eup %2852  ;;  %v2543_v21 = vclamps-f32 %v1868_v8, 5.0  ;;  %v1932_v58 = vmul.f32 %v1804_v23, %v4116_v28  ;;  %2858 = vtanh.f32 %v1359_v29  ;;  %v1360_v4 = vmul.f32 0.7978846, %v1232_v37  ;;  %v4254_v51 = vpop.f32.mrb[63].mxu0  ;;  %v4899_v23 = vld [vmem:[#allocation21_spill] sm:$0xff]  ;;  %v4900_v29 = vld [vmem:[#allocation22_spill] sm:$0xff] }
 0x1be   : > { %2315 = vst [vmem:[%s3432_s26 + $0x300] sm:$0xff] %v2606_v11  ;;  %v1869_v39 = vmul.f32 %v1741_v27, %v4126_v48  ;;  %v1677_v60 = vadd.f32 1.0, %v2853_v36  ;;  %2860 = vtanh.f32 %v1423_v46  ;;  %v912_v32 = vmul.f32 %v4208_v45, %v4208_v45  ;;  %4898 = vst [vmem:[#allocation20_spill] sm:$0xff] %v4254_v51 }
 0x1bf   : > { %2252 = vst [vmem:[%s3432_s26 + $0x108] sm:$0xff] %v2543_v21  ;;  %v2607_v10 = vclamps-f32 %v1932_v58, 5.0  ;;  %2862 = vtanh.f32 %v1360_v4  ;;  %v849_v28 = vmul.f32 %v4218_v26, %v4218_v26  ;;  %v4247_v48 = vadd.f32 %v3683_v7, %v3278_v43  ;;  %v4901_v21 = vld [vmem:[#allocation23_spill] sm:$0xff] }
 0x1c0   : > { %v2544_v35 = vclamps-f32 %v1869_v39, 5.0  ;;  %v1805_v47 = vmul.f32 0.5, %v1677_v60  ;;  %v1040_v18 = vmul.f32 %v912_v32, %v4208_v45  ;;  %v4252_v6 = vadd.f32 %v4897_v62, %v3280_v44 }
 0x1c1   : > { %2316 = vst [vmem:[%s3432_s26 + $0x308] sm:$0xff] %v2607_v10  ;;  %v977_v61 = vmul.f32 %v849_v28, %v4218_v26  ;;  %v913_v8 = vmul.f32 %v4247_v48, %v4247_v48  ;;  %v4262_v7 = vadd.f32 %v4899_v23, %v3280_v44  ;;  %v4266_v37 = vadd.f32 %v4900_v29, %v3278_v43 }
 0x1c2   : > { %v2855_v11 = vpop.eup %2854  ;;  %2253 = vst [vmem:[%s3432_s26 + $0x110] sm:$0xff] %v2544_v35  ;;  %v1933_v27 = vmul.f32 %v1805_v47, %v4130_v63  ;;  %v1168_v46 = vmul.f32 0.044715, %v1040_v18  ;;  %v850_v36 = vmul.f32 %v4252_v6, %v4252_v6  ;;  %v4274_v58 = vadd.f32 %v4901_v21, %v3278_v43 }
 0x1c3   : > { %v1614_v4 = vadd.f32 1.0, %v2855_v11  ;;  %v1105_v39 = vmul.f32 0.044715, %v977_v61  ;;  %v1041_v60 = vmul.f32 %v913_v8, %v4247_v48  ;;  %v914_v32 = vmul.f32 %v4262_v7, %v4262_v7  ;;  %v4285_v61 = vpop.f32.mrb[63].mxu1 }
 0x1c4   : > { %v2608_v10 = vclamps-f32 %v1933_v27, 5.0  ;;  %v1296_v28 = vadd.f32 %v1168_v46, %v4208_v45  ;;  %v978_v63 = vmul.f32 %v850_v36, %v4252_v6  ;;  %v851_v35 = vmul.f32 %v4266_v37, %v4266_v37  ;;  %4902 = vst [vmem:[#allocation21_spill] sm:$0xff] %v4285_v61 }
 0x1c5   : > { %v1742_v47 = vmul.f32 0.5, %v1614_v4  ;;  %v1233_v18 = vadd.f32 %v1105_v39, %v4218_v26  ;;  %v1169_v62 = vmul.f32 0.044715, %v1041_v60  ;;  %v1042_v23 = vmul.f32 %v914_v32, %v4262_v7 }
 0x1c6   : > { %v2857_v8 = vpop.eup %2856  ;;  %2317 = vst [vmem:[%s3432_s26 + $0x310] sm:$0xff] %v2608_v10  ;;  %v1424_v29 = vmul.f32 0.7978846, %v1296_v28  ;;  %v1106_v11 = vmul.f32 0.044715, %v978_v63  ;;  %v979_v27 = vmul.f32 %v851_v35, %v4266_v37  ;;  %v915_v46 = vmul.f32 %v4274_v58, %v4274_v58 }
 0x1c7   : > { %v2859_v36 = vpop.eup %2858  ;;  %v1870_v21 = vmul.f32 %v1742_v47, %v4157_v0  ;;  %v1678_v4 = vadd.f32 1.0, %v2857_v8  ;;  %v1361_v51 = vmul.f32 0.7978846, %v1233_v18  ;;  %v1297_v39 = vadd.f32 %v1169_v62, %v4247_v48 }
 0x1c8   : > { %v2861_v60 = vpop.eup %2860  ;;  %v1615_v32 = vadd.f32 1.0, %v2859_v36  ;;  %2864 = vtanh.f32 %v1424_v29  ;;  %v1234_v10 = vadd.f32 %v1106_v11, %v4252_v6  ;;  %v1170_v28 = vmul.f32 0.044715, %v1042_v23 }
 0x1c9   : > { %v2863_v63 = vpop.eup %2862  ;;  %v2545_v61 = vclamps-f32 %v1870_v21, 5.0  ;;  %v1806_v35 = vmul.f32 0.5, %v1678_v4  ;;  %v1679_v33 = vadd.f32 1.0, %v2861_v60  ;;  %2866 = vtanh.f32 %v1361_v51 }
 0x1ca   : > { %v1743_v34 = vmul.f32 0.5, %v1615_v32  ;;  %v1616_v2 = vadd.f32 1.0, %v2863_v63  ;;  %v1425_v42 = vmul.f32 0.7978846, %v1297_v39  ;;  %v1362_v0 = vmul.f32 0.7978846, %v1234_v10 }
 0x1cb   : > { %2254 = vst [vmem:[%s3432_s26 + $0x118] sm:$0xff] %v2545_v61  ;;  %v1934_v47 = vmul.f32 %v1806_v35, %v4178_v12  ;;  %v1807_v18 = vmul.f32 0.5, %v1679_v33  ;;  %v1298_v62 = vadd.f32 %v1170_v28, %v4262_v7  ;;  %v1107_v8 = vmul.f32 0.044715, %v979_v27 }
 0x1cc   : > { %v1871_v29 = vmul.f32 %v1743_v34, %v4183_v38  ;;  %v1744_v23 = vmul.f32 0.5, %v1616_v2  ;;  %2868 = vtanh.f32 %v1425_v42  ;;  %v1043_v11 = vmul.f32 %v915_v46, %v4274_v58  ;;  %v4903_v42 = vld [vmem:[#allocation24_spill] sm:$0xff] }
 0x1cd   : > { %v2609_v51 = vclamps-f32 %v1934_v47, 5.0  ;;  %v1935_v36 = vmul.f32 %v1807_v18, %v4187_v54  ;;  %2870 = vtanh.f32 %v1362_v0  ;;  %v1426_v61 = vmul.f32 0.7978846, %v1298_v62 }
 0x1ce   : > { %v2546_v21 = vclamps-f32 %v1871_v29, 5.0  ;;  %v1872_v12 = vmul.f32 %v1744_v23, %v4194_v13  ;;  %v1235_v33 = vadd.f32 %v1107_v8, %v4266_v37  ;;  %v1171_v4 = vmul.f32 0.044715, %v1043_v11 }
 0x1cf   : > { %2318 = vst [vmem:[%s3432_s26 + $0x318] sm:$0xff] %v2609_v51  ;;  %v2610_v38 = vclamps-f32 %v1935_v36, 5.0  ;;  %2872 = vtanh.f32 %v1426_v61  ;;  %v4305_v2 = vadd.f32 %v4903_v42, %v3280_v44  ;;  %v4309_v54 = vadd.f32 %v3753_v16, %v3280_v44 }
 0x1d0   : > { %2255 = vst [vmem:[%s3432_s26 + $0x120] sm:$0xff] %v2546_v21  ;;  %v2547_v34 = vclamps-f32 %v1872_v12, 5.0  ;;  %v1363_v27 = vmul.f32 0.7978846, %v1235_v33  ;;  %v1299_v13 = vadd.f32 %v1171_v4, %v4274_v58  ;;  %v4315_v46 = vadd.f32 %v3761_v9, %v3278_v43 }
 0x1d1   : > { %2319 = vst [vmem:[%s3432_s26 + $0x320] sm:$0xff] %v2610_v38  ;;  %v852_v39 = vmul.f32 %v4305_v2, %v4305_v2  ;;  %v916_v60 = vmul.f32 %v4309_v54, %v4309_v54  ;;  %v4324_v16 = vadd.f32 %v3763_v3, %v3278_v43  ;;  %v4328_v32 = vadd.f32 %v3781_v56, %v3280_v44 }
 0x1d2   : > { %v2865_v10 = vpop.eup %2864  ;;  %2256 = vst [vmem:[%s3432_s26 + $0x128] sm:$0xff] %v2547_v34  ;;  %2874 = vtanh.f32 %v1363_v27  ;;  %v1427_v9 = vmul.f32 0.7978846, %v1299_v13  ;;  %v853_v28 = vmul.f32 %v4315_v46, %v4315_v46  ;;  %v4335_v63 = vadd.f32 %v3799_v53, %v3280_v44 }
 0x1d3   : > { %v2867_v35 = vpop.eup %2866  ;;  %v1680_v0 = vadd.f32 1.0, %v2865_v10  ;;  %v980_v3 = vmul.f32 %v852_v39, %v4305_v2  ;;  %v1044_v47 = vmul.f32 %v916_v60, %v4309_v54  ;;  %v917_v56 = vmul.f32 %v4324_v16, %v4324_v16 }
 0x1d4   : > { %v1617_v18 = vadd.f32 1.0, %v2867_v35  ;;  %2876 = vtanh.f32 %v1427_v9  ;;  %v981_v62 = vmul.f32 %v853_v28, %v4315_v46  ;;  %v854_v8 = vmul.f32 %v4328_v32, %v4328_v32 }
 0x1d5   : > { %v1808_v29 = vmul.f32 0.5, %v1680_v0  ;;  %v1108_v23 = vmul.f32 0.044715, %v980_v3  ;;  %v1172_v53 = vmul.f32 0.044715, %v1044_v47  ;;  %v1045_v11 = vmul.f32 %v917_v56, %v4324_v16 }
 0x1d6   : > { %v2869_v51 = vpop.eup %2868  ;;  %v1745_v36 = vmul.f32 0.5, %v1617_v18  ;;  %v1109_v61 = vmul.f32 0.044715, %v981_v62  ;;  %v982_v21 = vmul.f32 %v854_v8, %v4328_v32  ;;  %v918_v12 = vmul.f32 %v4335_v63, %v4335_v63 }
 0x1d7   : > { %v2871_v33 = vpop.eup %2870  ;;  %v1936_v4 = vmul.f32 %v1808_v29, %v4208_v45  ;;  %v1681_v38 = vadd.f32 1.0, %v2869_v51  ;;  %v1236_v42 = vadd.f32 %v1108_v23, %v4305_v2  ;;  %v1300_v34 = vadd.f32 %v1172_v53, %v4309_v54 }
 0x1d8   : > { %v1873_v27 = vmul.f32 %v1745_v36, %v4218_v26  ;;  %v1618_v13 = vadd.f32 1.0, %v2871_v33  ;;  %v1237_v39 = vadd.f32 %v1109_v61, %v4315_v46  ;;  %v1173_v60 = vmul.f32 0.044715, %v1045_v11 }
 0x1d9   : > { %v2873_v10 = vpop.eup %2872  ;;  %v2611_v9 = vclamps-f32 %v1936_v4, 5.0  ;;  %v1809_v28 = vmul.f32 0.5, %v1681_v38  ;;  %v1364_v35 = vmul.f32 0.7978846, %v1236_v42  ;;  %v1428_v0 = vmul.f32 0.7978846, %v1300_v34 }
 0x1da   : > { %v2548_v3 = vclamps-f32 %v1873_v27, 5.0  ;;  %v1746_v45 = vmul.f32 0.5, %v1618_v13  ;;  %v1682_v47 = vadd.f32 1.0, %v2873_v10  ;;  %v1365_v56 = vmul.f32 0.7978846, %v1237_v39 }
 0x1db   : > { %2320 = vst [vmem:[%s3432_s26 + $0x328] sm:$0xff] %v2611_v9  ;;  %v1937_v18 = vmul.f32 %v1809_v28, %v4247_v48  ;;  %2878 = vtanh.f32 %v1364_v35  ;;  %v1301_v26 = vadd.f32 %v1173_v60, %v4324_v16  ;;  %v1110_v62 = vmul.f32 0.044715, %v982_v21 }
 0x1dc   : > { %v2875_v8 = vpop.eup %2874  ;;  %2257 = vst [vmem:[%s3432_s26 + $0x130] sm:$0xff] %v2548_v3  ;;  %v1874_v29 = vmul.f32 %v1746_v45, %v4252_v6  ;;  %v1810_v23 = vmul.f32 0.5, %v1682_v47  ;;  %2880 = vtanh.f32 %v1428_v0  ;;  %v1046_v53 = vmul.f32 %v918_v12, %v4335_v63 }
 0x1dd   : > { %v2612_v11 = vclamps-f32 %v1937_v18, 5.0  ;;  %v1619_v51 = vadd.f32 1.0, %v2875_v8  ;;  %2882 = vtanh.f32 %v1365_v56  ;;  %v1429_v36 = vmul.f32 0.7978846, %v1301_v26 }
 0x1de   : > { %v2877_v61 = vpop.eup %2876  ;;  %v2549_v48 = vclamps-f32 %v1874_v29, 5.0  ;;  %v1938_v33 = vmul.f32 %v1810_v23, %v4262_v7  ;;  %v1238_v21 = vadd.f32 %v1110_v62, %v4328_v32  ;;  %v1174_v4 = vmul.f32 0.044715, %v1046_v53 }
 0x1df   : > { %2321 = vst [vmem:[%s3432_s26 + $0x330] sm:$0xff] %v2612_v11  ;;  %v1747_v38 = vmul.f32 0.5, %v1619_v51  ;;  %v1683_v6 = vadd.f32 1.0, %v2877_v61  ;;  %2884 = vtanh.f32 %v1429_v36  ;;  %v4364_v42 = vadd.f32 %v3820_v19, %v3278_v43 }
 0x1e0   : > { %2258 = vst [vmem:[%s3432_s26 + $0x138] sm:$0xff] %v2549_v48  ;;  %v2613_v12 = vclamps-f32 %v1938_v33, 5.0  ;;  %v1366_v34 = vmul.f32 0.7978846, %v1238_v21  ;;  %v1302_v27 = vadd.f32 %v1174_v4, %v4335_v63  ;;  %v4370_v7 = vadd.f32 %v3823_v5, %v3278_v43 }
 0x1e1   : > { %v1875_v13 = vmul.f32 %v1747_v38, %v4266_v37  ;;  %v1811_v39 = vmul.f32 0.5, %v1683_v6  ;;  %v855_v60 = vmul.f32 %v4364_v42, %v4364_v42  ;;  %v4377_v19 = vadd.f32 %v3829_v15, %v3280_v44 }
 0x1e2   : > { %2322 = vst [vmem:[%s3432_s26 + $0x338] sm:$0xff] %v2613_v12  ;;  %2886 = vtanh.f32 %v1366_v34  ;;  %v1430_v10 = vmul.f32 0.7978846, %v1302_v27  ;;  %v919_v9 = vmul.f32 %v4370_v7, %v4370_v7  ;;  %v4384_v5 = vadd.f32 %v3831_v22, %v3280_v44 }
 0x1e3   : > { %v2550_v37 = vclamps-f32 %v1875_v13, 5.0  ;;  %v1939_v28 = vmul.f32 %v1811_v39, %v4274_v58  ;;  %v983_v35 = vmul.f32 %v855_v60, %v4364_v42  ;;  %v856_v0 = vmul.f32 %v4377_v19, %v4377_v19 }
 0x1e4   : > { %2888 = vtanh.f32 %v1430_v10  ;;  %v1047_v15 = vmul.f32 %v919_v9, %v4370_v7  ;;  %v920_v3 = vmul.f32 %v4384_v5, %v4384_v5  ;;  %v4395_v45 = vadd.f32 %v3848_v24, %v3278_v43 }
 0x1e5   : > { %v2879_v22 = vpop.eup %2878  ;;  %2259 = vst [vmem:[%s3432_s26 + $0x140] sm:$0xff] %v2550_v37  ;;  %v2614_v47 = vclamps-f32 %v1939_v28, 5.0  ;;  %v1111_v58 = vmul.f32 0.044715, %v983_v35  ;;  %v984_v56 = vmul.f32 %v856_v0, %v4377_v19  ;;  %v4401_v18 = vadd.f32 %v3872_v49, %v3278_v43 }
 0x1e6   : > { %v2881_v26 = vpop.eup %2880  ;;  %v1620_v62 = vadd.f32 1.0, %v2879_v22  ;;  %v1175_v8 = vmul.f32 0.044715, %v1047_v15  ;;  %v1048_v29 = vmul.f32 %v920_v3, %v4384_v5  ;;  %v857_v23 = vmul.f32 %v4395_v45, %v4395_v45 }
 0x1e7   : > { %v2883_v24 = vpop.eup %2882  ;;  %2323 = vst [vmem:[%s3432_s26 + $0x340] sm:$0xff] %v2614_v47  ;;  %v1684_v53 = vadd.f32 1.0, %v2881_v26  ;;  %v1239_v11 = vadd.f32 %v1111_v58, %v4364_v42  ;;  %v1112_v51 = vmul.f32 0.044715, %v984_v56  ;;  %v921_v36 = vmul.f32 %v4401_v18, %v4401_v18 }
 0x1e8   : > { %v1748_v61 = vmul.f32 0.5, %v1620_v62  ;;  %v1621_v49 = vadd.f32 1.0, %v2883_v24  ;;  %v1303_v48 = vadd.f32 %v1175_v8, %v4370_v7  ;;  %v1176_v33 = vmul.f32 0.044715, %v1048_v29 }
 0x1e9   : > { %v2885_v21 = vpop.eup %2884  ;;  %v1812_v4 = vmul.f32 0.5, %v1684_v53  ;;  %v1367_v38 = vmul.f32 0.7978846, %v1239_v11  ;;  %v1240_v6 = vadd.f32 %v1112_v51, %v4377_v19  ;;  %v985_v12 = vmul.f32 %v857_v23, %v4395_v45 }
 0x1ea   : > { %v1876_v34 = vmul.f32 %v1748_v61, %v4305_v2  ;;  %v1749_v27 = vmul.f32 0.5, %v1621_v49  ;;  %v1685_v13 = vadd.f32 1.0, %v2885_v21  ;;  %v1431_v39 = vmul.f32 0.7978846, %v1303_v48 }
 0x1eb   : > { %v1940_v60 = vmul.f32 %v1812_v4, %v4309_v54  ;;  %2890 = vtanh.f32 %v1367_v38  ;;  %v1368_v10 = vmul.f32 0.7978846, %v1240_v6  ;;  %v1304_v9 = vadd.f32 %v1176_v33, %v4384_v5 }
 0x1ec   : > { %v2887_v37 = vpop.eup %2886  ;;  %v2551_v28 = vclamps-f32 %v1876_v34, 5.0  ;;  %v1877_v35 = vmul.f32 %v1749_v27, %v4315_v46  ;;  %v1813_v0 = vmul.f32 0.5, %v1685_v13  ;;  %2892 = vtanh.f32 %v1431_v39 }
 0x1ed   : > { %v2615_v15 = vclamps-f32 %v1940_v60, 5.0  ;;  %v1622_v2 = vadd.f32 1.0, %v2887_v37  ;;  %2894 = vtanh.f32 %v1368_v10  ;;  %v1432_v3 = vmul.f32 0.7978846, %v1304_v9 }
 0x1ee   : > { %v2889_v22 = vpop.eup %2888  ;;  %2260 = vst [vmem:[%s3432_s26 + $0x148] sm:$0xff] %v2551_v28  ;;  %v2552_v47 = vclamps-f32 %v1877_v35, 5.0  ;;  %v1941_v54 = vmul.f32 %v1813_v0, %v4324_v16  ;;  %v1113_v58 = vmul.f32 0.044715, %v985_v12  ;;  %v1049_v56 = vmul.f32 %v921_v36, %v4401_v18 }
 0x1ef   : > { %2324 = vst [vmem:[%s3432_s26 + $0x348] sm:$0xff] %v2615_v15  ;;  %v1750_v26 = vmul.f32 0.5, %v1622_v2  ;;  %v1686_v62 = vadd.f32 1.0, %v2889_v22  ;;  %2896 = vtanh.f32 %v1432_v3  ;;  %v4423_v46 = vadd.f32 %v3883_v55, %v3280_v44 }
 0x1f0   : > { %2261 = vst [vmem:[%s3432_s26 + $0x150] sm:$0xff] %v2552_v47  ;;  %v2616_v8 = vclamps-f32 %v1941_v54, 5.0  ;;  %v1241_v29 = vadd.f32 %v1113_v58, %v4395_v45  ;;  %v1177_v23 = vmul.f32 0.044715, %v1049_v56  ;;  %v4429_v16 = vadd.f32 %v3892_v1, %v3280_v44 }
 0x1f1   : > { %v1878_v24 = vmul.f32 %v1750_v26, %v4328_v32  ;;  %v1814_v53 = vmul.f32 0.5, %v1686_v62  ;;  %v858_v11 = vmul.f32 %v4423_v46, %v4423_v46  ;;  %v4436_v55 = vadd.f32 %v3922_v14, %v3278_v43 }
 0x1f2   : > { %2325 = vst [vmem:[%s3432_s26 + $0x350] sm:$0xff] %v2616_v8  ;;  %v1369_v51 = vmul.f32 0.7978846, %v1241_v29  ;;  %v1305_v36 = vadd.f32 %v1177_v23, %v4401_v18  ;;  %v922_v61 = vmul.f32 %v4429_v16, %v4429_v16  ;;  %v4444_v1 = vadd.f32 %v3924_v30, %v3278_v43 }
 0x1f3   : > { %v2553_v32 = vclamps-f32 %v1878_v24, 5.0  ;;  %v1942_v49 = vmul.f32 %v1814_v53, %v4335_v63  ;;  %v986_v48 = vmul.f32 %v858_v11, %v4423_v46  ;;  %v859_v14 = vmul.f32 %v4436_v55, %v4436_v55 }
 0x1f4   : > { %2898 = vtanh.f32 %v1369_v51  ;;  %v1433_v33 = vmul.f32 0.7978846, %v1305_v36  ;;  %v1050_v21 = vmul.f32 %v922_v61, %v4429_v16  ;;  %v923_v4 = vmul.f32 %v4444_v1, %v4444_v1 }
 0x1f5   : > { %v2891_v38 = vpop.eup %2890  ;;  %2262 = vst [vmem:[%s3432_s26 + $0x158] sm:$0xff] %v2553_v32  ;;  %v2617_v30 = vclamps-f32 %v1942_v49, 5.0  ;;  %v1114_v6 = vmul.f32 0.044715, %v986_v48  ;;  %v987_v12 = vmul.f32 %v859_v14, %v4436_v55  ;;  %v4457_v63 = vadd.f32 %v3935_v20, %v3280_v44 }
 0x1f6   : > { %v2893_v34 = vpop.eup %2892  ;;  %v1623_v27 = vadd.f32 1.0, %v2891_v38  ;;  %2900 = vtanh.f32 %v1433_v33  ;;  %v1178_v13 = vmul.f32 0.044715, %v1050_v21  ;;  %v1051_v39 = vmul.f32 %v923_v4, %v4444_v1  ;;  %v4904_v4 = vld [vmem:[#allocation25_spill] sm:$0xff] }
 0x1f7   : > { %v2895_v60 = vpop.eup %2894  ;;  %2326 = vst [vmem:[%s3432_s26 + $0x358] sm:$0xff] %v2617_v30  ;;  %v1687_v10 = vadd.f32 1.0, %v2893_v34  ;;  %v1242_v9 = vadd.f32 %v1114_v6, %v4423_v46  ;;  %v1115_v37 = vmul.f32 0.044715, %v987_v12  ;;  %v860_v28 = vmul.f32 %v4457_v63, %v4457_v63 }
 0x1f8   : > { %v1751_v35 = vmul.f32 0.5, %v1623_v27  ;;  %v1624_v0 = vadd.f32 1.0, %v2895_v60  ;;  %v1306_v20 = vadd.f32 %v1178_v13, %v4429_v16  ;;  %v1179_v15 = vmul.f32 0.044715, %v1051_v39  ;;  %v4905_v39 = vld [vmem:[#allocation26_spill] sm:$0xff] }
 0x1f9   : > { %v2897_v2 = vpop.eup %2896  ;;  %v1815_v3 = vmul.f32 0.5, %v1687_v10  ;;  %v1370_v22 = vmul.f32 0.7978846, %v1242_v9  ;;  %v1243_v47 = vadd.f32 %v1115_v37, %v4436_v55  ;;  %v988_v54 = vmul.f32 %v860_v28, %v4457_v63 }
 0x1fa   : > { %v1879_v58 = vmul.f32 %v1751_v35, %v4364_v42  ;;  %v1752_v56 = vmul.f32 0.5, %v1624_v0  ;;  %v1688_v26 = vadd.f32 1.0, %v2897_v2  ;;  %v1434_v62 = vmul.f32 0.7978846, %v1306_v20 }
 0x1fb   : > { %v1943_v8 = vmul.f32 %v1815_v3, %v4370_v7  ;;  %2902 = vtanh.f32 %v1370_v22  ;;  %v1371_v29 = vmul.f32 0.7978846, %v1243_v47  ;;  %v1307_v23 = vadd.f32 %v1179_v15, %v4444_v1  ;;  %v4906_v47 = vld [vmem:[#allocation5_spill] sm:$0xff] }
 0x1fc   : > { %v2554_v24 = vclamps-f32 %v1879_v58, 5.0  ;;  %v1880_v53 = vmul.f32 %v1752_v56, %v4377_v19  ;;  %v1816_v11 = vmul.f32 0.5, %v1688_v26  ;;  %2904 = vtanh.f32 %v1434_v62 }
 0x1fd   : > { %v2618_v51 = vclamps-f32 %v1943_v8, 5.0  ;;  %2906 = vtanh.f32 %v1371_v29  ;;  %v1435_v42 = vmul.f32 0.7978846, %v1307_v23  ;;  %v1116_v36 = vmul.f32 0.044715, %v988_v54 }
 0x1fe   : > { %v2899_v61 = vpop.eup %2898  ;;  %2263 = vst [vmem:[%s3432_s26 + $0x160] sm:$0xff] %v2554_v24  ;;  %v2555_v32 = vclamps-f32 %v1880_v53, 5.0  ;;  %v1944_v7 = vmul.f32 %v1816_v11, %v4384_v5  ;;  %v4475_v49 = vadd.f32 %v3940_v40, %v3280_v44  ;;  %v4479_v48 = vadd.f32 %v3959_v57, %v3278_v43 }
 0x1ff   : > { %2327 = vst [vmem:[%s3432_s26 + $0x360] sm:$0xff] %v2618_v51  ;;  %v1625_v19 = vadd.f32 1.0, %v2899_v61  ;;  %2908 = vtanh.f32 %v1435_v42  ;;  %v1244_v14 = vadd.f32 %v1116_v36, %v4457_v63  ;;  %v4485_v33 = vadd.f32 %v3961_v31, %v3278_v43 }
 0x200   : > { %v2901_v21 = vpop.eup %2900  ;;  %2264 = vst [vmem:[%s3432_s26 + $0x168] sm:$0xff] %v2555_v32  ;;  %v2619_v5 = vclamps-f32 %v1944_v7, 5.0  ;;  %v924_v40 = vmul.f32 %v4475_v49, %v4475_v49  ;;  %v861_v57 = vmul.f32 %v4479_v48, %v4479_v48  ;;  %v4494_v38 = vadd.f32 %v4904_v4, %v3280_v44 }
 0x201   : > { %v1753_v30 = vmul.f32 0.5, %v1625_v19  ;;  %v1689_v6 = vadd.f32 1.0, %v2901_v21  ;;  %v1372_v12 = vmul.f32 0.7978846, %v1244_v14  ;;  %v925_v31 = vmul.f32 %v4485_v33, %v4485_v33 }
 0x202   : > { %2328 = vst [vmem:[%s3432_s26 + $0x368] sm:$0xff] %v2619_v5  ;;  %v1052_v34 = vmul.f32 %v924_v40, %v4475_v49  ;;  %v989_v27 = vmul.f32 %v861_v57, %v4479_v48  ;;  %v862_v13 = vmul.f32 %v4494_v38, %v4494_v38  ;;  %v4505_v60 = vadd.f32 %v4905_v39, %v3280_v44 }
 0x203   : > { %v1881_v10 = vmul.f32 %v1753_v30, %v4395_v45  ;;  %v1817_v9 = vmul.f32 0.5, %v1689_v6  ;;  %2910 = vtanh.f32 %v1372_v12  ;;  %v1053_v37 = vmul.f32 %v925_v31, %v4485_v33 }
 0x204   : > { %v1180_v28 = vmul.f32 0.044715, %v1052_v34  ;;  %v1117_v35 = vmul.f32 0.044715, %v989_v27  ;;  %v990_v0 = vmul.f32 %v862_v13, %v4494_v38  ;;  %v926_v20 = vmul.f32 %v4505_v60, %v4505_v60 }
 0x205   : > { %v2903_v15 = vpop.eup %2902  ;;  %v2556_v2 = vclamps-f32 %v1881_v10, 5.0  ;;  %v1945_v3 = vmul.f32 %v1817_v9, %v4401_v18  ;;  %v1181_v22 = vmul.f32 0.044715, %v1053_v37  ;;  %v4515_v45 = vadd.f32 %v4906_v47, %v3278_v43  ;;  %v4907_v37 = vld [vmem:[#allocation6_spill] sm:$0xff] }
 0x206   : > { %v2905_v54 = vpop.eup %2904  ;;  %v1626_v58 = vadd.f32 1.0, %v2903_v15  ;;  %v1308_v56 = vadd.f32 %v1180_v28, %v4475_v49  ;;  %v1245_v26 = vadd.f32 %v1117_v35, %v4479_v48  ;;  %v1118_v62 = vmul.f32 0.044715, %v990_v0 }
 0x207   : > { %v2907_v8 = vpop.eup %2906  ;;  %2265 = vst [vmem:[%s3432_s26 + $0x170] sm:$0xff] %v2556_v2  ;;  %v2620_v29 = vclamps-f32 %v1945_v3, 5.0  ;;  %v1690_v23 = vadd.f32 1.0, %v2905_v54  ;;  %v1309_v24 = vadd.f32 %v1181_v22, %v4485_v33  ;;  %v1054_v18 = vmul.f32 %v926_v20, %v4505_v60  ;;  %v4909_v3 = vld [vmem:[#allocation27_spill] sm:$0xff] }
 0x208   : > { %v1754_v53 = vmul.f32 0.5, %v1626_v58  ;;  %v1627_v11 = vadd.f32 1.0, %v2907_v8  ;;  %v1436_v51 = vmul.f32 0.7978846, %v1308_v56  ;;  %v1373_v42 = vmul.f32 0.7978846, %v1245_v26 }
 0x209   : > { %v2909_v36 = vpop.eup %2908  ;;  %2329 = vst [vmem:[%s3432_s26 + $0x370] sm:$0xff] %v2620_v29  ;;  %v1818_v61 = vmul.f32 0.5, %v1690_v23  ;;  %v1437_v32 = vmul.f32 0.7978846, %v1309_v24  ;;  %v1246_v7 = vadd.f32 %v1118_v62, %v4494_v38  ;;  %v1182_v19 = vmul.f32 0.044715, %v1054_v18 }
 0x20a   : > { %v1882_v14 = vmul.f32 %v1754_v53, %v4423_v46  ;;  %v1755_v21 = vmul.f32 0.5, %v1627_v11  ;;  %v1691_v5 = vadd.f32 1.0, %v2909_v36  ;;  %2912 = vtanh.f32 %v1436_v51  ;;  %v4910_v56 = vld [vmem:[#allocation8_spill] sm:$0xff] }
 0x20b   : > { %v1946_v40 = vmul.f32 %v1818_v61, %v4429_v16  ;;  %2914 = vtanh.f32 %v1373_v42  ;;  %v1374_v57 = vmul.f32 0.7978846, %v1246_v7  ;;  %v1310_v4 = vadd.f32 %v1182_v19, %v4505_v60 }
 0x20c   : > { %v2557_v30 = vclamps-f32 %v1882_v14, 5.0  ;;  %v1883_v6 = vmul.f32 %v1755_v21, %v4436_v55  ;;  %v1819_v12 = vmul.f32 0.5, %v1691_v5  ;;  %2916 = vtanh.f32 %v1437_v32 }
 0x20d   : > { %v2911_v31 = vpop.eup %2910  ;;  %v2621_v34 = vclamps-f32 %v1946_v40, 5.0  ;;  %2918 = vtanh.f32 %v1374_v57  ;;  %v1438_v46 = vmul.f32 0.7978846, %v1310_v4  ;;  %v863_v27 = vmul.f32 %v4515_v45, %v4515_v45 }
 0x20e   : > { %2266 = vst [vmem:[%s3432_s26 + $0x178] sm:$0xff] %v2557_v30  ;;  %v2558_v16 = vclamps-f32 %v1883_v6, 5.0  ;;  %v1947_v13 = vmul.f32 %v1819_v12, %v4444_v1  ;;  %v1628_v39 = vadd.f32 1.0, %v2911_v31  ;;  %v4534_v10 = vadd.f32 %v4024_v52, %v3278_v43  ;;  %v4908_v52 = vld [vmem:[#allocation7_spill] sm:$0xff] }
 0x20f   : > { %2330 = vst [vmem:[%s3432_s26 + $0x378] sm:$0xff] %v2621_v34  ;;  %2920 = vtanh.f32 %v1438_v46  ;;  %v991_v55 = vmul.f32 %v863_v27, %v4515_v45  ;;  %v4540_v9 = vadd.f32 %v4032_v50, %v3280_v44  ;;  %v4544_v28 = vadd.f32 %v4907_v37, %v3280_v44 }
 0x210   : > { %2267 = vst [vmem:[%s3432_s26 + $0x180] sm:$0xff] %v2558_v16  ;;  %v2622_v1 = vclamps-f32 %v1947_v13, 5.0  ;;  %v1756_v35 = vmul.f32 0.5, %v1628_v39  ;;  %v927_v0 = vmul.f32 %v4534_v10, %v4534_v10  ;;  %v4551_v20 = vadd.f32 %v4908_v52, %v3278_v43 }
 0x211   : > { %v1119_v15 = vmul.f32 0.044715, %v991_v55  ;;  %v864_v2 = vmul.f32 %v4540_v9, %v4540_v9  ;;  %v928_v50 = vmul.f32 %v4544_v28, %v4544_v28  ;;  %v4559_v22 = vadd.f32 %v4909_v3, %v3278_v43 }
 0x212   : > { %2331 = vst [vmem:[%s3432_s26 + $0x380] sm:$0xff] %v2622_v1  ;;  %v1884_v47 = vmul.f32 %v1756_v35, %v4457_v63  ;;  %v1055_v54 = vmul.f32 %v927_v0, %v4534_v10  ;;  %v865_v58 = vmul.f32 %v4551_v20, %v4551_v20  ;;  %v4568_v26 = vadd.f32 %v4910_v56, %v3280_v44 }
 0x213   : > { %v1247_v62 = vadd.f32 %v1119_v15, %v4515_v45  ;;  %v992_v8 = vmul.f32 %v864_v2, %v4540_v9  ;;  %v1056_v29 = vmul.f32 %v928_v50, %v4544_v28  ;;  %v929_v23 = vmul.f32 %v4559_v22, %v4559_v22 }
 0x214   : > { %v2913_v63 = vpop.eup %2912  ;;  %v2559_v24 = vclamps-f32 %v1884_v47, 5.0  ;;  %v1183_v18 = vmul.f32 0.044715, %v1055_v54  ;;  %v993_v53 = vmul.f32 %v865_v58, %v4551_v20  ;;  %v866_v11 = vmul.f32 %v4568_v26, %v4568_v26 }
 0x215   : > { %v2915_v51 = vpop.eup %2914  ;;  %v1692_v42 = vadd.f32 1.0, %v2913_v63  ;;  %v1375_v36 = vmul.f32 0.7978846, %v1247_v62  ;;  %v1120_v61 = vmul.f32 0.044715, %v992_v8  ;;  %v1057_v32 = vmul.f32 %v929_v23, %v4559_v22  ;;  %v4911_v8 = vld [vmem:[#allocation9_spill] sm:$0xff] }
 0x216   : > { %v2917_v7 = vpop.eup %2916  ;;  %2268 = vst [vmem:[%s3432_s26 + $0x188] sm:$0xff] %v2559_v24  ;;  %v1629_v19 = vadd.f32 1.0, %v2915_v51  ;;  %v1311_v14 = vadd.f32 %v1183_v18, %v4534_v10  ;;  %v1184_v21 = vmul.f32 0.044715, %v1056_v29  ;;  %v1121_v5 = vmul.f32 0.044715, %v993_v53 }
 0x217   : > { %v2919_v40 = vpop.eup %2918  ;;  %v1820_v57 = vmul.f32 0.5, %v1692_v42  ;;  %v1693_v4 = vadd.f32 1.0, %v2917_v7  ;;  %2922 = vtanh.f32 %v1375_v36  ;;  %v1248_v30 = vadd.f32 %v1120_v61, %v4540_v9  ;;  %v4913_v24 = vld [vmem:[#allocation11_spill] sm:$0xff] }
 0x218   : > { %v1757_v6 = vmul.f32 0.5, %v1629_v19  ;;  %v1630_v12 = vadd.f32 1.0, %v2919_v40  ;;  %v1439_v31 = vmul.f32 0.7978846, %v1311_v14  ;;  %v1312_v34 = vadd.f32 %v1184_v21, %v4544_v28 }
 0x219   : > { %v2921_v46 = vpop.eup %2920  ;;  %v1948_v27 = vmul.f32 %v1820_v57, %v4475_v49  ;;  %v1821_v16 = vmul.f32 0.5, %v1693_v4  ;;  %v1376_v13 = vmul.f32 0.7978846, %v1248_v30  ;;  %v1249_v39 = vadd.f32 %v1121_v5, %v4551_v20 }
 0x21a   : > { %v1885_v55 = vmul.f32 %v1757_v6, %v4479_v48  ;;  %v1758_v37 = vmul.f32 0.5, %v1630_v12  ;;  %v1694_v1 = vadd.f32 1.0, %v2921_v46  ;;  %2924 = vtanh.f32 %v1439_v31 }
 0x21b   : > { %v2623_v35 = vclamps-f32 %v1948_v27, 5.0  ;;  %v1949_v0 = vmul.f32 %v1821_v16, %v4485_v33  ;;  %2926 = vtanh.f32 %v1376_v13  ;;  %v1440_v52 = vmul.f32 0.7978846, %v1312_v34 }
 0x21c   : > { %v2560_v15 = vclamps-f32 %v1885_v55, 5.0  ;;  %v1886_v49 = vmul.f32 %v1758_v37, %v4494_v38  ;;  %v1822_v2 = vmul.f32 0.5, %v1694_v1  ;;  %v1377_v50 = vmul.f32 0.7978846, %v1249_v39 }
 0x21d   : > { %2332 = vst [vmem:[%s3432_s26 + $0x388] sm:$0xff] %v2623_v35  ;;  %v2624_v3 = vclamps-f32 %v1949_v0, 5.0  ;;  %2928 = vtanh.f32 %v1440_v52  ;;  %v1185_v48 = vmul.f32 0.044715, %v1057_v32  ;;  %v994_v47 = vmul.f32 %v866_v11, %v4568_v26 }
 0x21e   : > { %2269 = vst [vmem:[%s3432_s26 + $0x190] sm:$0xff] %v2560_v15  ;;  %v2561_v54 = vclamps-f32 %v1886_v49, 5.0  ;;  %v1950_v58 = vmul.f32 %v1822_v2, %v4505_v60  ;;  %2930 = vtanh.f32 %v1377_v50  ;;  %v4594_v33 = vadd.f32 %v4086_v41, %v3280_v44  ;;  %v4912_v41 = vld [vmem:[#allocation10_spill] sm:$0xff] }
 0x21f   : > { %2333 = vst [vmem:[%s3432_s26 + $0x390] sm:$0xff] %v2624_v3  ;;  %v1313_v38 = vadd.f32 %v1185_v48, %v4559_v22  ;;  %v1122_v56 = vmul.f32 0.044715, %v994_v47  ;;  %v4600_v62 = vadd.f32 %v4118_v25, %v3278_v43  ;;  %v4604_v29 = vadd.f32 %v4911_v8, %v3278_v43 }
 0x220   : > { %2270 = vst [vmem:[%s3432_s26 + $0x198] sm:$0xff] %v2561_v54  ;;  %v2625_v60 = vclamps-f32 %v1950_v58, 5.0  ;;  %v930_v23 = vmul.f32 %v4594_v33, %v4594_v33  ;;  %v4611_v63 = vadd.f32 %v4912_v41, %v3280_v44  ;;  %v4615_v18 = vadd.f32 %v4913_v24, %v3280_v44 }
 0x221   : > { %v2923_v53 = vpop.eup %2922  ;;  %v1441_v25 = vmul.f32 0.7978846, %v1313_v38  ;;  %v1250_v11 = vadd.f32 %v1122_v56, %v4568_v26  ;;  %v867_v51 = vmul.f32 %v4600_v62, %v4600_v62  ;;  %v931_v42 = vmul.f32 %v4604_v29, %v4604_v29 }
 0x222   : > { %2334 = vst [vmem:[%s3432_s26 + $0x398] sm:$0xff] %v2625_v60  ;;  %v1631_v36 = vadd.f32 1.0, %v2923_v53  ;;  %v1058_v61 = vmul.f32 %v930_v23, %v4594_v33  ;;  %v868_v32 = vmul.f32 %v4611_v63, %v4611_v63  ;;  %v932_v7 = vmul.f32 %v4615_v18, %v4615_v18  ;;  %v4914_v53 = vld [vmem:[#allocation12_spill] sm:$0xff] }
 0x223   : > { %2932 = vtanh.f32 %v1441_v25  ;;  %v1378_v19 = vmul.f32 0.7978846, %v1250_v11  ;;  %v995_v14 = vmul.f32 %v867_v51, %v4600_v62  ;;  %v1059_v21 = vmul.f32 %v931_v42, %v4604_v29 }
 0x224   : > { %v2925_v5 = vpop.eup %2924  ;;  %v1759_v40 = vmul.f32 0.5, %v1631_v36  ;;  %v1186_v57 = vmul.f32 0.044715, %v1058_v61  ;;  %v996_v4 = vmul.f32 %v868_v32, %v4611_v63  ;;  %v1060_v30 = vmul.f32 %v932_v7, %v4615_v18 }
 0x225   : > { %v2927_v6 = vpop.eup %2926  ;;  %v1695_v12 = vadd.f32 1.0, %v2925_v5  ;;  %2934 = vtanh.f32 %v1378_v19  ;;  %v1123_v31 = vmul.f32 0.044715, %v995_v14  ;;  %v1187_v34 = vmul.f32 0.044715, %v1059_v21  ;;  %v4915_v14 = vld [vmem:[#allocation13_spill] sm:$0xff] }
 0x226   : > { %v1887_v46 = vmul.f32 %v1759_v40, %v4515_v45  ;;  %v1632_v27 = vadd.f32 1.0, %v2927_v6  ;;  %v1314_v16 = vadd.f32 %v1186_v57, %v4594_v33  ;;  %v1124_v13 = vmul.f32 0.044715, %v996_v4  ;;  %v4916_v40 = vld [vmem:[#allocation14_spill] sm:$0xff]  ;;  %v4917_v4 = vld [vmem:[#allocation15_spill] sm:$0xff] }
 0x227   : > { %v2929_v39 = vpop.eup %2928  ;;  %v1823_v55 = vmul.f32 0.5, %v1695_v12  ;;  %v1251_v37 = vadd.f32 %v1123_v31, %v4600_v62  ;;  %v1315_v1 = vadd.f32 %v1187_v34, %v4604_v29  ;;  %v1188_v35 = vmul.f32 0.044715, %v1060_v30 }
 0x228   : > { %v2931_v0 = vpop.eup %2930  ;;  %v2562_v52 = vclamps-f32 %v1887_v46, 5.0  ;;  %v1760_v15 = vmul.f32 0.5, %v1632_v27  ;;  %v1696_v49 = vadd.f32 1.0, %v2929_v39  ;;  %v1442_v2 = vmul.f32 0.7978846, %v1314_v16 }
 0x229   : > { %v1951_v50 = vmul.f32 %v1823_v55, %v4534_v10  ;;  %v1633_v45 = vadd.f32 1.0, %v2931_v0  ;;  %v1379_v3 = vmul.f32 0.7978846, %v1251_v37  ;;  %v1443_v48 = vmul.f32 0.7978846, %v1315_v1 }
 0x22a   : > { %2271 = vst [vmem:[%s3432_s26 + $0x1a0] sm:$0xff] %v2562_v52  ;;  %v1888_v47 = vmul.f32 %v1760_v15, %v4540_v9  ;;  %v1824_v54 = vmul.f32 0.5, %v1696_v49  ;;  %2936 = vtanh.f32 %v1442_v2  ;;  %v1252_v58 = vadd.f32 %v1124_v13, %v4611_v63 }
 0x22b   : > { %v2626_v38 = vclamps-f32 %v1951_v50, 5.0  ;;  %v1761_v56 = vmul.f32 0.5, %v1633_v45  ;;  %2938 = vtanh.f32 %v1379_v3  ;;  %v1316_v8 = vadd.f32 %v1188_v35, %v4615_v18 }
 0x22c   : > { %v2563_v60 = vclamps-f32 %v1888_v47, 5.0  ;;  %v1952_v10 = vmul.f32 %v1824_v54, %v4544_v28  ;;  %2940 = vtanh.f32 %v1443_v48  ;;  %v1380_v23 = vmul.f32 0.7978846, %v1252_v58 }
 0x22d   : > { %v2933_v41 = vpop.eup %2932  ;;  %2335 = vst [vmem:[%s3432_s26 + $0x3a0] sm:$0xff] %v2626_v38  ;;  %v1889_v9 = vmul.f32 %v1761_v56, %v4551_v20  ;;  %v1444_v24 = vmul.f32 0.7978846, %v1316_v8  ;;  %v4646_v25 = vadd.f32 %v4914_v53, %v3278_v43  ;;  %v4650_v11 = vadd.f32 %v4162_v59, %v3278_v43 }
 0x22e   : > { %2272 = vst [vmem:[%s3432_s26 + $0x1a8] sm:$0xff] %v2563_v60  ;;  %v2627_v51 = vclamps-f32 %v1952_v10, 5.0  ;;  %v1697_v28 = vadd.f32 1.0, %v2933_v41  ;;  %2942 = vtanh.f32 %v1380_v23  ;;  %v4655_v42 = vadd.f32 %v4168_v17, %v3280_v44 }
 0x22f   : > { %v2935_v36 = vpop.eup %2934  ;;  %v2564_v20 = vclamps-f32 %v1889_v9, 5.0  ;;  %2944 = vtanh.f32 %v1444_v24  ;;  %v869_v61 = vmul.f32 %v4646_v25, %v4646_v25  ;;  %v933_v32 = vmul.f32 %v4650_v11, %v4650_v11 }
 0x230   : > { %2336 = vst [vmem:[%s3432_s26 + $0x3a8] sm:$0xff] %v2627_v51  ;;  %v1825_v59 = vmul.f32 0.5, %v1697_v28  ;;  %v1634_v7 = vadd.f32 1.0, %v2935_v36  ;;  %v870_v19 = vmul.f32 %v4655_v42, %v4655_v42  ;;  %v4666_v21 = vadd.f32 %v4915_v14, %v3280_v44  ;;  %v4918_v14 = vld [vmem:[#allocation16_spill] sm:$0xff] }
 0x231   : > { %2273 = vst [vmem:[%s3432_s26 + $0x1b0] sm:$0xff] %v2564_v20  ;;  %v997_v17 = vmul.f32 %v869_v61, %v4646_v25  ;;  %v1061_v5 = vmul.f32 %v933_v32, %v4650_v11  ;;  %v4673_v57 = vadd.f32 %v4916_v40, %v3278_v43  ;;  %v4677_v30 = vadd.f32 %v4917_v4, %v3278_v43  ;;  %v4919_v40 = vld [vmem:[#allocation17_spill] sm:$0xff] }
 0x232   : > { %v1953_v6 = vmul.f32 %v1825_v59, %v4559_v22  ;;  %v1762_v12 = vmul.f32 0.5, %v1634_v7  ;;  %v998_v31 = vmul.f32 %v870_v19, %v4655_v42  ;;  %v934_v34 = vmul.f32 %v4666_v21, %v4666_v21 }
 0x233   : > { %v1125_v46 = vmul.f32 0.044715, %v997_v17  ;;  %v1189_v27 = vmul.f32 0.044715, %v1061_v5  ;;  %v871_v16 = vmul.f32 %v4673_v57, %v4673_v57  ;;  %v935_v13 = vmul.f32 %v4677_v30, %v4677_v30 }
 0x234   : > { %v2937_v39 = vpop.eup %2936  ;;  %v2628_v55 = vclamps-f32 %v1953_v6, 5.0  ;;  %v1890_v37 = vmul.f32 %v1762_v12, %v4568_v26  ;;  %v1126_v22 = vmul.f32 0.044715, %v998_v31  ;;  %v1062_v1 = vmul.f32 %v934_v34, %v4666_v21  ;;  %v4920_v6 = vld [vmem:[#allocation18_spill] sm:$0xff] }
 0x235   : > { %v2939_v35 = vpop.eup %2938  ;;  %v1698_v0 = vadd.f32 1.0, %v2937_v39  ;;  %v1253_v52 = vadd.f32 %v1125_v46, %v4646_v25  ;;  %v1317_v15 = vadd.f32 %v1189_v27, %v4650_v11  ;;  %v999_v49 = vmul.f32 %v871_v16, %v4673_v57  ;;  %v4921_v46 = vld [vmem:[#allocation19_spill] sm:$0xff] }
 0x236   : > { %v2941_v2 = vpop.eup %2940  ;;  %2337 = vst [vmem:[%s3432_s26 + $0x3b0] sm:$0xff] %v2628_v55  ;;  %v2565_v50 = vclamps-f32 %v1890_v37, 5.0  ;;  %v1635_v45 = vadd.f32 1.0, %v2939_v35  ;;  %v1254_v3 = vadd.f32 %v1126_v22, %v4655_v42  ;;  %v1190_v48 = vmul.f32 0.044715, %v1062_v1  ;;  %v4922_v22 = vld [vmem:[#allocation20_spill] sm:$0xff] }
 0x237   : > { %v1826_v26 = vmul.f32 0.5, %v1698_v0  ;;  %v1699_v47 = vadd.f32 1.0, %v2941_v2  ;;  %v1381_v54 = vmul.f32 0.7978846, %v1253_v52  ;;  %v1445_v58 = vmul.f32 0.7978846, %v1317_v15 }
 0x238   : > { %v2943_v38 = vpop.eup %2942  ;;  %2274 = vst [vmem:[%s3432_s26 + $0x1b8] sm:$0xff] %v2565_v50  ;;  %v1763_v56 = vmul.f32 0.5, %v1635_v45  ;;  %v1382_v8 = vmul.f32 0.7978846, %v1254_v3  ;;  %v1318_v60 = vadd.f32 %v1190_v48, %v4666_v21  ;;  %v1127_v10 = vmul.f32 0.044715, %v999_v49 }
 0x239   : > { %v2945_v23 = vpop.eup %2944  ;;  %v1954_v41 = vmul.f32 %v1826_v26, %v4594_v33  ;;  %v1827_v9 = vmul.f32 0.5, %v1699_v47  ;;  %v1636_v24 = vadd.f32 1.0, %v2943_v38  ;;  %2946 = vtanh.f32 %v1381_v54  ;;  %v4923_v0 = vld [vmem:[#allocation21_spill] sm:$0xff] }
 0x23a   : > { %v1891_v53 = vmul.f32 %v1763_v56, %v4600_v62  ;;  %v1700_v51 = vadd.f32 1.0, %v2945_v23  ;;  %2948 = vtanh.f32 %v1445_v58  ;;  %v1446_v28 = vmul.f32 0.7978846, %v1318_v60 }
 0x23b   : > { %v2629_v36 = vclamps-f32 %v1954_v41, 5.0  ;;  %v1955_v20 = vmul.f32 %v1827_v9, %v4604_v29  ;;  %v1764_v61 = vmul.f32 0.5, %v1636_v24  ;;  %2950 = vtanh.f32 %v1382_v8 }
 0x23c   : > { %v2566_v32 = vclamps-f32 %v1891_v53, 5.0  ;;  %v1828_v59 = vmul.f32 0.5, %v1700_v51  ;;  %2952 = vtanh.f32 %v1446_v28  ;;  %v1255_v33 = vadd.f32 %v1127_v10, %v4673_v57 }
 0x23d   : > { %2338 = vst [vmem:[%s3432_s26 + $0x3b8] sm:$0xff] %v2629_v36  ;;  %v2630_v7 = vclamps-f32 %v1955_v20, 5.0  ;;  %v1892_v19 = vmul.f32 %v1764_v61, %v4611_v63  ;;  %v1063_v62 = vmul.f32 %v935_v13, %v4677_v30  ;;  %v4705_v17 = vadd.f32 %v4918_v14, %v3280_v44 }
 0x23e   : > { %2275 = vst [vmem:[%s3432_s26 + $0x1c0] sm:$0xff] %v2566_v32  ;;  %v1956_v29 = vmul.f32 %v1828_v59, %v4615_v18  ;;  %v1383_v5 = vmul.f32 0.7978846, %v1255_v33  ;;  %v4711_v4 = vadd.f32 %v4919_v40, %v3280_v44  ;;  %v4715_v12 = vadd.f32 %v4920_v6, %v3278_v43 }
 0x23f   : > { %2339 = vst [vmem:[%s3432_s26 + $0x3c0] sm:$0xff] %v2630_v7  ;;  %v2567_v63 = vclamps-f32 %v1892_v19, 5.0  ;;  %v1191_v31 = vmul.f32 0.044715, %v1063_v62  ;;  %v872_v34 = vmul.f32 %v4705_v17, %v4705_v17  ;;  %v4722_v27 = vadd.f32 %v4921_v46, %v3278_v43 }
 0x240   : > { %v2631_v18 = vclamps-f32 %v1956_v29, 5.0  ;;  %2954 = vtanh.f32 %v1383_v5  ;;  %v936_v16 = vmul.f32 %v4711_v4, %v4711_v4  ;;  %v873_v13 = vmul.f32 %v4715_v12, %v4715_v12 }
 0x241   : > { %2276 = vst [vmem:[%s3432_s26 + $0x1c8] sm:$0xff] %v2567_v63  ;;  %v1319_v39 = vadd.f32 %v1191_v31, %v4677_v30  ;;  %v1000_v55 = vmul.f32 %v872_v34, %v4705_v17  ;;  %v937_v37 = vmul.f32 %v4722_v27, %v4722_v27  ;;  %v4735_v43 = vadd.f32 %v4922_v22, %v3280_v44 }
 0x242   : > { %2340 = vst [vmem:[%s3432_s26 + $0x3c8] sm:$0xff] %v2631_v18  ;;  %v1064_v1 = vmul.f32 %v936_v16, %v4711_v4  ;;  %v1001_v35 = vmul.f32 %v873_v13, %v4715_v12  ;;  %v4742_v52 = vadd.f32 %v4923_v0, %v3280_v44 }
 0x243   : > { %v2947_v15 = vpop.eup %2946  ;;  %v1447_v49 = vmul.f32 0.7978846, %v1319_v39  ;;  %v1128_v2 = vmul.f32 0.044715, %v1000_v55  ;;  %v1065_v50 = vmul.f32 %v937_v37, %v4722_v27  ;;  %v874_v45 = vmul.f32 %v4735_v43, %v4735_v43 }
 0x244   : > { %v2949_v3 = vpop.eup %2948  ;;  %v1637_v48 = vadd.f32 1.0, %v2947_v15  ;;  %v1192_v26 = vmul.f32 0.044715, %v1064_v1  ;;  %v1129_v47 = vmul.f32 0.044715, %v1001_v35  ;;  %v938_v54 = vmul.f32 %v4742_v52, %v4742_v52 }
 0x245   : > { %v2951_v58 = vpop.eup %2950  ;;  %v1701_v38 = vadd.f32 1.0, %v2949_v3  ;;  %2956 = vtanh.f32 %v1447_v49  ;;  %v1256_v44 = vadd.f32 %v1128_v2, %v4705_v17  ;;  %v1193_v56 = vmul.f32 0.044715, %v1065_v50 }
 0x246   : > { %v2953_v8 = vpop.eup %2952  ;;  %v1765_v60 = vmul.f32 0.5, %v1637_v48  ;;  %v1638_v10 = vadd.f32 1.0, %v2951_v58  ;;  %v1320_v23 = vadd.f32 %v1192_v26, %v4711_v4  ;;  %v1257_v41 = vadd.f32 %v1129_v47, %v4715_v12 }
 0x247   : > { %v1829_v9 = vmul.f32 0.5, %v1701_v38  ;;  %v1702_v24 = vadd.f32 1.0, %v2953_v8  ;;  %v1384_v53 = vmul.f32 0.7978846, %v1256_v44  ;;  %v1321_v51 = vadd.f32 %v1193_v56, %v4722_v27 }
 0x248   : > { %v1893_v28 = vmul.f32 %v1765_v60, %v4646_v25  ;;  %v1766_v36 = vmul.f32 0.5, %v1638_v10  ;;  %v1448_v20 = vmul.f32 0.7978846, %v1320_v23  ;;  %v1385_v61 = vmul.f32 0.7978846, %v1257_v41 }
 0x249   : > { %v1957_v32 = vmul.f32 %v1829_v9, %v4650_v11  ;;  %v1830_v59 = vmul.f32 0.5, %v1702_v24  ;;  %2958 = vtanh.f32 %v1384_v53  ;;  %v1449_v33 = vmul.f32 0.7978846, %v1321_v51 }
 0x24a   : > { %v2955_v7 = vpop.eup %2954  ;;  %v2568_v19 = vclamps-f32 %v1893_v28, 5.0  ;;  %v1894_v62 = vmul.f32 %v1766_v36, %v4655_v42  ;;  %2960 = vtanh.f32 %v1448_v20  ;;  %v1002_v14 = vmul.f32 %v874_v45, %v4735_v43 }
 0x24b   : > { %v2632_v29 = vclamps-f32 %v1957_v32, 5.0  ;;  %v1958_v25 = vmul.f32 %v1830_v59, %v4666_v21  ;;  %v1639_v5 = vadd.f32 1.0, %v2955_v7  ;;  %2962 = vtanh.f32 %v1385_v61 }
 0x24c   : > { %2277 = vst [vmem:[%s3432_s26 + $0x1d0] sm:$0xff] %v2568_v19  ;;  %v2569_v11 = vclamps-f32 %v1894_v62, 5.0  ;;  %2964 = vtanh.f32 %v1449_v33  ;;  %v1130_v40 = vmul.f32 0.044715, %v1002_v14  ;;  %v1066_v6 = vmul.f32 %v938_v54, %v4742_v52 }
 0x24d   : > { %2341 = vst [vmem:[%s3432_s26 + $0x3d0] sm:$0xff] %v2632_v29  ;;  %v2633_v63 = vclamps-f32 %v1958_v25, 5.0  ;;  %v1767_v31 = vmul.f32 0.5, %v1639_v5 }
 0x24e   : > { %2278 = vst [vmem:[%s3432_s26 + $0x1d8] sm:$0xff] %v2569_v11  ;;  %v1258_v42 = vadd.f32 %v1130_v40, %v4735_v43  ;;  %v1194_v34 = vmul.f32 0.044715, %v1066_v6 }
 0x24f   : > { %v2957_v46 = vpop.eup %2956  ;;  %2342 = vst [vmem:[%s3432_s26 + $0x3d8] sm:$0xff] %v2633_v63  ;;  %v1895_v21 = vmul.f32 %v1767_v31, %v4673_v57 }
 0x250   : > { %v1703_v18 = vadd.f32 1.0, %v2957_v46  ;;  %v1386_v16 = vmul.f32 0.7978846, %v1258_v42  ;;  %v1322_v13 = vadd.f32 %v1194_v34, %v4742_v52 }
 0x251   : > { %v2570_v39 = vclamps-f32 %v1895_v21, 5.0 }
 0x252   : > { %v1831_v55 = vmul.f32 0.5, %v1703_v18  ;;  %2966 = vtanh.f32 %v1386_v16  ;;  %v1450_v37 = vmul.f32 0.7978846, %v1322_v13 }
 0x253   : > { %v2959_v22 = vpop.eup %2958  ;;  %2279 = vst [vmem:[%s3432_s26 + $0x1e0] sm:$0xff] %v2570_v39 }
 0x254   : > { %v2961_v1 = vpop.eup %2960  ;;  %v1959_v35 = vmul.f32 %v1831_v55, %v4677_v30  ;;  %v1640_v0 = vadd.f32 1.0, %v2959_v22  ;;  %2968 = vtanh.f32 %v1450_v37 }
 0x255   : > { %v2963_v15 = vpop.eup %2962  ;;  %v1704_v49 = vadd.f32 1.0, %v2961_v1 }
 0x256   : > { %v2965_v2 = vpop.eup %2964  ;;  %v2634_v57 = vclamps-f32 %v1959_v35, 5.0  ;;  %v1768_v50 = vmul.f32 0.5, %v1640_v0  ;;  %v1641_v45 = vadd.f32 1.0, %v2963_v15 }
 0x257   : > { %v1832_v3 = vmul.f32 0.5, %v1704_v49  ;;  %v1705_v48 = vadd.f32 1.0, %v2965_v2 }
 0x258   : > { %2343 = vst [vmem:[%s3432_s26 + $0x3e0] sm:$0xff] %v2634_v57  ;;  %v1896_v26 = vmul.f32 %v1768_v50, %v4705_v17  ;;  %v1769_v47 = vmul.f32 0.5, %v1641_v45 }
 0x259   : > { %v1960_v30 = vmul.f32 %v1832_v3, %v4711_v4  ;;  %v1833_v54 = vmul.f32 0.5, %v1705_v48 }
 0x25a   : > { %v2571_v58 = vclamps-f32 %v1896_v26, 5.0  ;;  %v1897_v38 = vmul.f32 %v1769_v47, %v4715_v12 }
 0x25b   : > { %v2635_v44 = vclamps-f32 %v1960_v30, 5.0  ;;  %v1961_v56 = vmul.f32 %v1833_v54, %v4722_v27 }
 0x25c   : > { %v2967_v8 = vpop.eup %2966  ;;  %2280 = vst [vmem:[%s3432_s26 + $0x1e8] sm:$0xff] %v2571_v58  ;;  %v2572_v60 = vclamps-f32 %v1897_v38, 5.0 }
 0x25d   : > { %2344 = vst [vmem:[%s3432_s26 + $0x3e8] sm:$0xff] %v2635_v44  ;;  %v2636_v10 = vclamps-f32 %v1961_v56, 5.0  ;;  %v1642_v17 = vadd.f32 1.0, %v2967_v8 }
 0x25e   : > { %v2969_v23 = vpop.eup %2968  ;;  %2281 = vst [vmem:[%s3432_s26 + $0x1f0] sm:$0xff] %v2572_v60 }
 0x25f   : > { %2345 = vst [vmem:[%s3432_s26 + $0x3f0] sm:$0xff] %v2636_v10  ;;  %v1770_v4 = vmul.f32 0.5, %v1642_v17  ;;  %v1706_v12 = vadd.f32 1.0, %v2969_v23 }
 0x261   : > { %v1898_v41 = vmul.f32 %v1770_v4, %v4735_v43  ;;  %v1834_v9 = vmul.f32 0.5, %v1706_v12 }
 0x263   : > { %v2573_v27 = vclamps-f32 %v1898_v41, 5.0  ;;  %v1962_v24 = vmul.f32 %v1834_v9, %v4742_v52 }
 0x265   : > { %2282 = vst [vmem:[%s3432_s26 + $0x1f8] sm:$0xff] %v2573_v27  ;;  %v2637_v53 = vclamps-f32 %v1962_v24, 5.0 }
 0x267   : > { %2346 = vst [vmem:[%s3432_s26 + $0x3f8] sm:$0xff] %v2637_v53 }
 0x268   : > { %2983 = shalt.err (!%p2980_p5)
}
 0x269   : > { %s2984_s9 = scalar_lea.hbm %s4784_s4, 16384  ;;  %s2988_s18 = scalar_lea.hbm %s4841_s3, 32768 }
 0x26a   : > { %p2985_p6 = scmp.ne.s32.totalorder %s4784_s4, %s2984_s9  ;;  %p2989_p10 = scmp.lt.u32.totalorder %s4784_s4, %s4841_s3 }
 0x26b   : > { %p2990_p11 = scmp.lt.u32.totalorder %s2988_s18, %s2984_s9  ;;  %p2992_p13 = scmp.lt.u32.totalorder %s2984_s9, %s4784_s4 }
 0x26c   : > { %p2986_p7 = pnand %p2985_p6, %p3114_p4 }
 0x26d   : > { %p2991_p12 = por %p2990_p11, %p2989_p10 }
 0x26e   : > { %p2987_p9 = pneg %p2986_p7 }
 0x26f   : > { %p2993_p0 = por %p2992_p13, %p2991_p12 }
 0x271   : > { %p2994_p1 = pnand %p2993_p0, %p2987_p9 }
 0x273   : > { %2997 = shalt.err (!%p2994_p1)
}
 0x274   : > { %s3052_s23 = smov 256   ;;  %s3053_s26 = smov 16  }
 0x275   : > { %2650 = dma.vmem_to_hbm [thread:$0]  (%p3114_p4), %s4786_s28, 16384, %s4784_s4, %s4792_s5, %s3052_s23, %s3052_s23, %s3053_s26  }
 0x276 PF: > { %p2656_p2 = scmp.ge.s32.totalorder %s3048_s17, 2  ;;  %s2379_s27 = sand.u32 1, %s3028_s12  }
 0x277   : > { %s2380_s29 = scalar_lea.sflag [#allocation3], %s2379_s27 }
 0x278   : > { %p2653_p3 = pnand %p2656_p2, %p3121_p8 }
 0x27a   : > { %3023 = dma.done.wait (!%p2653_p3), %s2380_s29, 16384  }
 0x27b   : > { %3025 = vsyncadd (!%p2653_p3), %s2380_s29, 4294950912  ;;  %s16_s17 = sadd.s32 1, %s3048_s17   ;;  %s4924_s12 = smov %s3032_s13 }
 0x27c   : > { %p13_p5 = scmp.ge.s32.totalorder %s16_s17, 4   ;;  %s4925_s13 = smov %s3036_s14 }
 0x27d   : > { %s4926_s14 = smov %s3127_s25  ;;  %s4927_s15 = smov %s3044_s16 }
 0x27e   : > { %s4928_s16 = smov %s4930_s20  ;;  %15 = sbr.rel (!%p13_p5) target bundleno = 4 (0x4), region = 73 }
 0x285   :  { %2385 = vsyncpa [#allocation3], 1 }
 0x286   :  { %2387 = vsyncpa [#allocation3 + $0x1], 1 }

</bundles_post_ra>
